<compile_context>
chip_gen: v7x
topology: tpu7x:2x2x1
jax: 0.10.0
libtpu: 0.0.40
codegen_flags: <defaults>
</compile_context>

<pallas_src>
import functools

import jax
import jax.numpy as jnp
from jax import lax
from jax.experimental import pallas as pl
from jax.experimental.pallas import tpu as pltpu

_THRESH_LO, _THRESH_HI = 0.1, 0.1   # lo == hi -> double threshold degenerates
_PAD = 4          # 2 (gauss) + 1 (sobel) + 1 (NMS neighbour ring)
_TAN225 = 0.41421356
_LANE = 128

# 5x5 gaussian (sigma ~= 1) / 273 -- fixed "parameters" of the Canny stage.
_GAUSS = [
    [1.0, 4.0, 7.0, 4.0, 1.0],
    [4.0, 16.0, 26.0, 16.0, 4.0],
    [7.0, 26.0, 41.0, 26.0, 7.0],
    [4.0, 16.0, 26.0, 16.0, 4.0],
    [1.0, 4.0, 7.0, 4.0, 1.0],
]
_GAUSS = [[v / 273.0 for v in row] for row in _GAUSS]
_SX = [[-1.0, 0.0, 1.0], [-2.0, 0.0, 2.0], [-1.0, 0.0, 1.0]]
_SY = [[-1.0, -2.0, -1.0], [0.0, 0.0, 0.0], [1.0, 2.0, 1.0]]


def _round_up(x, m):
    return (x + m - 1) // m * m


def _canny_kernel(gray_hbm, edges_ref, sobel_ref, inv_ref, xbuf, copy_sem):
    """One (image, row-band) step of the Canny front-end.

    gray_hbm : [B, Hpad+8, W_in] f32, HBM (pl.ANY)  lane-aligned padded gray
    edges_ref: [1, TH, W_out]    u8  VMEM block
    sobel_ref: [1, 2, TH, W_out] f32/bf16 VMEM block  (gx, gy)
    inv_ref  : [1, TH, W_out]    f32/bf16 VMEM block  1/|grad|
    xbuf     : [2, TH+8, W_in]   f32 VMEM scratch     double-buffered stripe
    copy_sem : DMA semaphores, shape (2,)

    Correctness of the manual double buffer relies on:
      * the row-band axis (axis 1) being the innermost, sequentially iterated
        grid axis on a core, and
      * the prefetch chain never crossing the "parallel" image axis (which may
        be sharded across TensorCores on multi-TC chips).
    """
    TH, W_out = edges_ref.shape[1], edges_ref.shape[2]
    P2 = 2 * _PAD
    b = pl.program_id(0)             # image axis   ("parallel", may be sharded)
    jh = pl.program_id(1)            # row-band axis ("arbitrary", carries chain)
    n_h = pl.num_programs(1)

    # ---- all scalar/index work BEFORE any DMA wait (wait breaks SMEM
    #      sst->sld forwarding) ----------------------------------------------
    cur = jh % 2
    nxt = 1 - cur
    row_cur = pl.multiple_of(jh * TH, 8)         # TH is always a multiple of 8
    row_nxt = pl.multiple_of(row_cur + TH, 8)
    have_next = jh + 1 < n_h

    def stripe_copy(row0, slot):
        return pltpu.make_async_copy(
            gray_hbm.at[b, pl.ds(row0, TH + P2), :],
            xbuf.at[slot],
            copy_sem.at[slot])

    # Prime the per-image chain at its first band.  (jh is never sharded, so
    # this fires on whichever core owns image b -- megacore safe.)
    @pl.when(jh == 0)
    def _():
        stripe_copy(row_cur, cur).start()

    # Prefetch the NEXT row band of the same image *before* waiting on the
    # current one: the stripe DMA overlaps this band's compute.
    @pl.when(have_next)
    def _():
        stripe_copy(row_nxt, nxt).start()

    stripe_copy(row_cur, cur).wait()

    HB, WB = TH + 4, W_out + 4
    x = xbuf[cur]                    # (TH+8, W_in) padded grayscale stripe
    x = x[:, :WB + 4]                # only the columns this band's outputs need

    # ---- 5x5 gaussian blur, exact, symmetric-factored.  Horizontal
    #      palindromic pair-sums on the raw stripe FIRST (4 lane-offset
    #      windows), then per-row coefficients (pure VALU), then the vertical
    #      palindromic combine (sublane shifts only). ------------------------
    h_a = x[:, 0:WB] + x[:, 4:WB + 4]        # cols 0 + 4 (identical coeffs)
    h_b = x[:, 1:WB + 1] + x[:, 3:WB + 3]    # cols 1 + 3
    h_c = x[:, 2:WB + 2]                     # col  2
    g0 = _GAUSS[0][0] * h_a + _GAUSS[0][1] * h_b + _GAUSS[0][2] * h_c
    g1 = _GAUSS[1][0] * h_a + _GAUSS[1][1] * h_b + _GAUSS[1][2] * h_c
    g2 = _GAUSS[2][0] * h_a + _GAUSS[2][1] * h_b + _GAUSS[2][2] * h_c
    blur = ((g0[0:HB] + g0[4:HB + 4])
            + (g1[1:HB + 1] + g1[3:HB + 3])
            + g2[2:HB + 2])                  # (HB, WB)

    # ---- 3x3 sobel, exact separable form ([1,2,1] smooth x [-1,0,1] diff) ---
    HM, WM = TH + 2, W_out + 2
    t_v = blur[0:HM] + 2.0 * blur[1:HM + 1] + blur[2:HM + 2]        # (HM, WB)
    gx = t_v[:, 2:WM + 2] - t_v[:, 0:WM]                            # (HM, WM)
    t_h = blur[:, 0:WM] + 2.0 * blur[:, 1:WM + 1] + blur[:, 2:WM + 2]  # (HB, WM)
    gy = t_h[2:HM + 2] - t_h[0:HM]                                  # (HM, WM)

    # ---- NMS + threshold on SQUARED magnitude (monotone => same edges; no
    #      sqrt over the haloed plane, no divide). ----------------------------
    mag2 = gx * gx + gy * gy
    c0 = mag2[:, 0:W_out]
    c1 = mag2[:, 1:W_out + 1]
    c2 = mag2[:, 2:W_out + 2]
    m2 = c1[1:TH + 1]
    m_l, m_r = c0[1:TH + 1], c2[1:TH + 1]
    m_u, m_d = c1[0:TH], c1[2:TH + 2]
    m_ul, m_ur = c0[0:TH], c2[0:TH]
    m_dl, m_dr = c0[2:TH + 2], c2[2:TH + 2]

    gxc = gx[1:TH + 1, 1:W_out + 1]
    gyc = gy[1:TH + 1, 1:W_out + 1]

    ax = jnp.abs(gxc)
    ay = jnp.abs(gyc)
    horiz = ay <= _TAN225 * ax
    vert = ax <= _TAN225 * ay
    samesign = (gxc * gyc) > 0.0

    n1 = jnp.where(horiz, m_l, jnp.where(vert, m_u, jnp.where(samesign, m_ul, m_ur)))
    n2 = jnp.where(horiz, m_r, jnp.where(vert, m_d, jnp.where(samesign, m_dr, m_dl)))
    keep = jnp.logical_and(m2 >= n1, m2 >= n2)
    edge = jnp.logical_and(keep, m2 > _THRESH_HI * _THRESH_HI)

    # 1/|grad| on the EUP.  At zero-gradient pixels this is ~1e12; the torch
    # module only consumes the normalization at edge pixels (m2 > 0.01).
    inv = lax.rsqrt(m2 + 1e-24)

    edges_ref[0, :, :] = edge.astype(edges_ref.dtype)
    sobel_ref[0, 0, :, :] = gxc.astype(sobel_ref.dtype)
    sobel_ref[0, 1, :, :] = gyc.astype(sobel_ref.dtype)
    inv_ref[0, :, :] = inv.astype(inv_ref.dtype)


def _vmem_budget():
    """Generation-aware VMEM sizing.

    v5e/v6e report 128 MiB -> (~72 MiB tile budget, 96 MiB scoped limit);
    v7x reports 64 MiB/TC -> (~36 MiB, 48 MiB).  Conservative 64 MiB fallback.
    """
    try:
        cap = int(pltpu.get_tpu_info().vmem_capacity_bytes)
        cap = max(cap, 32 * 2**20)
    except Exception:
        cap = 64 * 2**20
    return (cap * 9) // 16, (cap * 3) // 4


def _pick_tiling(H, w_in, tile_budget, tile_rows=None):
    """Row-band height TH and padded image height Hpad.

    TH is a multiple of 32 (uint8 edge blocks respect native (32,128) int8
    tiling) unless a single band covers the whole padded image.  H is padded
    to a multiple of TH -- no 'fall back to full H' path that could blow the
    v7x VMEM budget on awkward heights.
    """
    if tile_rows is not None:
        assert tile_rows % 8 == 0, "tile_rows must be a multiple of 8"
        hpad = _round_up(H, tile_rows)
        assert tile_rows % 32 == 0 or hpad == tile_rows, (
            "tile_rows must be a multiple of 32 (uint8 edge tiling) or cover "
            "the whole (8-padded) image")
        return tile_rows, hpad
    bytes_per_row = 4 * 30 * w_in                  # conservative live-plane count
    max_rows = max(32, (tile_budget // bytes_per_row) // 32 * 32)
    if H <= 32:
        th = _round_up(H, 8)                       # single band; block == full dims
        return th, th
    # >= 2 bands so the cross-band DMA prefetch chain actually overlaps.
    n_bands = max(2, -(-H // max_rows))
    th = min(max_rows, _round_up(-(-H // n_bands), 32))
    return th, _round_up(H, th)


@functools.partial(jax.jit, static_argnums=(1, 2, 3, 4, 5, 6))
def _canny_front_end(batch, th, hpad, w_out, w_in, vmem_limit, bf16_outputs):
    B, C, H, W = batch.shape
    n_h = hpad // th
    out_dt = jnp.bfloat16 if bf16_outputs else jnp.float32

    # Channel mean + zero pad as ONE fused XLA op producing only the padded,
    # lane-aligned gray plane the kernel DMAs from (last dim % 128 == 0, so
    # every stripe row is a dense, 512B-aligned transfer).
    gray_pad = jnp.pad(jnp.mean(batch.astype(jnp.float32), axis=1),
                       ((0, 0),
                        (_PAD, hpad + _PAD - H),
                        (_PAD, w_in - _PAD - W)))          # [B, hpad+8, w_in]

    out_shapes = (
        jax.ShapeDtypeStruct((B, hpad, w_out), jnp.uint8),     # edges {0,1}
        jax.ShapeDtypeStruct((B, 2, hpad, w_out), out_dt),     # sobel (gx, gy)
        jax.ShapeDtypeStruct((B, hpad, w_out), out_dt),        # 1/|grad|
    )

    edges_p, sobel_p, inv_p = pl.pallas_call(
        _canny_kernel,
        out_shape=out_shapes,
        grid=(B, n_h),                       # image outer, row band inner
        in_specs=[pl.BlockSpec(memory_space=pl.ANY)],   # raw HBM; manual halo DMA
        out_specs=(
            pl.BlockSpec((1, th, w_out), lambda b, j: (b, j, 0)),
            pl.BlockSpec((1, 2, th, w_out), lambda b, j: (b, 0, j, 0)),
            pl.BlockSpec((1, th, w_out), lambda b, j: (b, j, 0)),
        ),
        scratch_shapes=[
            pltpu.VMEM((2, th + 2 * _PAD, w_in), jnp.float32),
            pltpu.SemaphoreType.DMA((2,)),
        ],
        compiler_params=pltpu.CompilerParams(
            dimension_semantics=("parallel", "arbitrary"),
            vmem_limit_bytes=int(vmem_limit)),
    )(gray_pad)

    # Slice the lane/row padding back off (no-ops when W % 128 == 0, H % TH == 0).
    return (edges_p[:, :H, :W],
            sobel_p[:, :, :H, :W],
            inv_p[:, :H, :W])


def string_finder_front_end(batch, tile_rows=None, bf16_outputs=False):
    """Canny front-end of String_Finder_Tree.forward as one Pallas kernel.

    batch: [B, C, H, W] float32 (NCHW, as in the torch module).
    Returns:
      edges   [B, H, W]    uint8 {0,1}      (b_edges)
      sobel   [B, 2, H, W] f32 (or bf16)    (gx, gy)
      inv_mag [B, H, W]    f32 (or bf16)    1/|grad|; torch's per-edge-pixel
                                            unit `norms` == sobel * inv_mag.
    """
    B, C, H, W = batch.shape
    w_out = _round_up(W, _LANE)
    w_in = _round_up(w_out + 2 * _PAD, _LANE)
    tile_budget, vmem_limit = _vmem_budget()
    th, hpad = _pick_tiling(H, w_in, tile_budget, tile_rows)

    out = _canny_front_end(batch, th, hpad, w_out, w_in, vmem_limit,
                           bool(bf16_outputs))

    # TODO(synk): the rest of String_Finder_Tree.forward (t.nonzero with
    # data-dependent size, t.ops.my_ops.frnn_ts_kernel fixed-radius NN graph,
    # the UnionFind tree_table growth loop, oodl_draw) is dynamic-shape,
    # data-dependent CUDA-extension/host code with no static Pallas equivalent.
    # TODO(synk): on v5e, fusing the NCHW channel mean into the kernel (clamped
    # boundary DMAs + zero halo fill) would save ~8 B/px of HBM traffic.
    return out


def _reference_front_end(batch):
    """Pure-JAX reference with the naive 25-tap / 6-tap stencils."""
    gray = jnp.mean(batch.astype(jnp.float32), axis=1)
    B, H, W = gray.shape
    xp = jnp.pad(gray, ((0, 0), (_PAD, _PAD), (_PAD, _PAD)))
    HB, WB = H + 4, W + 4
    blur = jnp.zeros((B, HB, WB), jnp.float32)
    for di in range(5):
        for dj in range(5):
            blur = blur + _GAUSS[di][dj] * xp[:, di:di + HB, dj:dj + WB]
    HM, WM = H + 2, W + 2
    gx = jnp.zeros((B, HM, WM), jnp.float32)
    gy = jnp.zeros((B, HM, WM), jnp.float32)
    for di in range(3):
        for dj in range(3):
            win = blur[:, di:di + HM, dj:dj + WM]
            if _SX[di][dj] != 0.0:
                gx = gx + _SX[di][dj] * win
            if _SY[di][dj] != 0.0:
                gy = gy + _SY[di][dj] * win
    mag2 = gx * gx + gy * gy
    m2 = mag2[:, 1:1 + H, 1:1 + W]
    gxc = gx[:, 1:1 + H, 1:1 + W]
    gyc = gy[:, 1:1 + H, 1:1 + W]
    m_l, m_r = mag2[:, 1:1 + H, 0:W], mag2[:, 1:1 + H, 2:2 + W]
    m_u, m_d = mag2[:, 0:H, 1:1 + W], mag2[:, 2:2 + H, 1:1 + W]
    m_ul, m_ur = mag2[:, 0:H, 0:W], mag2[:, 0:H, 2:2 + W]
    m_dl, m_dr = mag2[:, 2:2 + H, 0:W], mag2[:, 2:2 + H, 2:2 + W]
    ax, ay = jnp.abs(gxc), jnp.abs(gyc)
    horiz = ay <= _TAN225 * ax
    vert = ax <= _TAN225 * ay
    samesign = (gxc * gyc) > 0.0
    n1 = jnp.where(horiz, m_l, jnp.where(vert, m_u, jnp.where(samesign, m_ul, m_ur)))
    n2 = jnp.where(horiz, m_r, jnp.where(vert, m_d, jnp.where(samesign, m_dr, m_dl)))
    keep = jnp.logical_and(m2 >= n1, m2 >= n2)
    edges = jnp.logical_and(keep, m2 > _THRESH_HI * _THRESH_HI).astype(jnp.float32)
    sobel = jnp.stack([gxc, gyc], axis=1)
    inv = lax.rsqrt(m2 + 1e-24)
    return edges, sobel, inv


def _run_and_check(batch, tile_rows=None):
    edges, sobel, inv_mag = string_finder_front_end(batch, tile_rows=tile_rows)
    jax.block_until_ready((edges, sobel, inv_mag))
    e_ref, s_ref, i_ref = _reference_front_end(batch)
    assert edges.dtype == jnp.uint8
    assert bool(jnp.allclose(sobel.astype(jnp.float32), s_ref,
                             atol=1e-4, rtol=1e-4)), "sobel mismatch"
    # Edges are not bit-exact vs the naive 25-tap association (>= ties in NMS
    # can flip under re-association); small mean-abs tolerance.
    assert float(jnp.mean(jnp.abs(edges.astype(jnp.float32) - e_ref))) < 0.02, \
        "edge-map mismatch"
    big = i_ref < 100.0   # compare 1/|grad| only away from zero-gradient pixels
    assert bool(jnp.allclose(jnp.where(big, inv_mag.astype(jnp.float32), 0.0),
                             jnp.where(big, i_ref, 0.0),
                             atol=1e-2, rtol=1e-3)), "inv_mag mismatch"
    return edges, sobel, inv_mag


if __name__ == "__main__":
    key = jax.random.PRNGKey(0)

    # small shape: one row band per image, lane padding W 16 -> 128 exercised
    B, C, H, W = 2, 3, 16, 16
    x = jax.random.uniform(key, (B, C, H, W), dtype=jnp.float32)
    edges, sobel, inv_mag = _run_and_check(x)
    assert edges.shape == (B, H, W)
    assert sobel.shape == (B, 2, H, W)
    assert inv_mag.shape == (B, H, W)

    # taller images with forced 32-row bands: exercises the haloed-stripe DMA,
    # the cross-band prefetch chain and uint8 sub-blocks (grid = (2 imgs, 2 bands)).
    x2 = jax.random.uniform(jax.random.PRNGKey(1), (2, 3, 64, 16), dtype=jnp.float32)
    edges2, sobel2, inv2 = _run_and_check(x2, tile_rows=32)
    assert edges2.shape == (2, 64, 16)
    assert sobel2.shape == (2, 2, 64, 16)

    print("KERNEL_OK")
</pallas_src>

<mosaic_0001>
module attributes {stable_mosaic.version = 11 : i64} {
  func.func @_canny_kernel(%arg0: i32, %arg1: i32, %arg2: memref<2x24x256xf32, #tpu.memory_space<any>>, %arg3: memref<1x16x128xi8, #tpu.memory_space<vmem>>, %arg4: memref<1x2x16x128xf32, #tpu.memory_space<vmem>>, %arg5: memref<1x16x128xf32, #tpu.memory_space<vmem>>, %arg6: memref<2x24x256xf32, #tpu.memory_space<vmem>>, %arg7: memref<2x!tpu.dma_semaphore, #tpu.memory_space<semaphore_mem>>) attributes {dimension_semantics = [#tpu.dimension_semantics<parallel>, #tpu.dimension_semantics<arbitrary>], iteration_bounds = array<i64: 2, 1>, scalar_prefetch = 0 : i64, scratch_operands = 2 : i64, tpu.core_type = #tpu.core_type<tc>, window_params = [{}, {transform_indices = @transform_1, window_bounds = array<i64: 1, 16, 128>}, {transform_indices = @transform_2, window_bounds = array<i64: 1, 2, 16, 128>}, {transform_indices = @transform_3, window_bounds = array<i64: 1, 16, 128>}]} {
    %c2_i32 = arith.constant 2 : i32
    %c0_i32 = arith.constant 0 : i32
    %0 = arith.cmpi eq, %c2_i32, %c0_i32 : i32
    %c1_i32 = arith.constant 1 : i32
    %1 = arith.select %0, %c1_i32, %c2_i32 : i32
    %2 = arith.remsi %arg1, %1 : i32
    %c0_i32_0 = arith.constant 0 : i32
    %3 = arith.cmpi ne, %2, %c0_i32_0 : i32
    %c0_i32_1 = arith.constant 0 : i32
    %4 = arith.cmpi slt, %2, %c0_i32_1 : i32
    %c0_i32_2 = arith.constant 0 : i32
    %5 = arith.cmpi slt, %1, %c0_i32_2 : i32
    %6 = arith.xori %4, %5 : i1
    %7 = arith.andi %6, %3 : i1
    %8 = arith.addi %2, %1 : i32
    %9 = arith.select %7, %8, %2 : i32
    %c1_i32_3 = arith.constant 1 : i32
    %10 = arith.subi %c1_i32_3, %9 : i32
    %c16_i32 = arith.constant 16 : i32
    %11 = arith.muli %arg1, %c16_i32 : i32
    %12 = tpu.assume_multiple %11, 8 : i32
    %c16_i32_4 = arith.constant 16 : i32
    %13 = arith.addi %12, %c16_i32_4 : i32
    %14 = tpu.assume_multiple %13, 8 : i32
    %c1_i32_5 = arith.constant 1 : i32
    %15 = arith.addi %arg1, %c1_i32_5 : i32
    %c1_i32_6 = arith.constant 1 : i32
    %16 = arith.cmpi slt, %15, %c1_i32_6 : i32
    %c0_i32_7 = arith.constant 0 : i32
    %17 = arith.cmpi eq, %arg1, %c0_i32_7 : i32
    %18 = arith.extui %17 : i1 to i32
    %c0_i32_8 = arith.constant 0 : i32
    %19 = arith.cmpi ne, %18, %c0_i32_8 : i32
    scf.if %19 {
      %c0_i32_42 = arith.constant 0 : i32
      %148 = tpu.memref_slice %arg2[%arg0, %12, %c0_i32_42] : memref<2x24x256xf32, #tpu.memory_space<any>> -> memref<1x24x256xf32, #tpu.memory_space<any>>
      %149 = tpu.memref_squeeze %148 : memref<1x24x256xf32, #tpu.memory_space<any>> -> memref<24x256xf32, #tpu.memory_space<any>>
      %c0_i32_43 = arith.constant 0 : i32
      %c0_i32_44 = arith.constant 0 : i32
      %150 = tpu.memref_slice %arg6[%9, %c0_i32_43, %c0_i32_44] : memref<2x24x256xf32, #tpu.memory_space<vmem>> -> memref<1x24x256xf32, #tpu.memory_space<vmem>>
      %151 = tpu.memref_squeeze %150 : memref<1x24x256xf32, #tpu.memory_space<vmem>> -> memref<24x256xf32, #tpu.memory_space<vmem>>
      %152 = tpu.memref_slice %arg7[%9] : memref<2x!tpu.dma_semaphore, #tpu.memory_space<semaphore_mem>> -> memref<1x!tpu.dma_semaphore, #tpu.memory_space<semaphore_mem>>
      %153 = tpu.memref_squeeze %152 : memref<1x!tpu.dma_semaphore, #tpu.memory_space<semaphore_mem>> -> memref<!tpu.dma_semaphore, #tpu.memory_space<semaphore_mem>>
      tpu.enqueue_dma source(%149 : memref<24x256xf32, #tpu.memory_space<any>>) target(%151 : memref<24x256xf32, #tpu.memory_space<vmem>>) target_semaphore(%153 : memref<!tpu.dma_semaphore, #tpu.memory_space<semaphore_mem>>)
    } else {
    }
    %20 = arith.extui %16 : i1 to i32
    %c0_i32_9 = arith.constant 0 : i32
    %21 = arith.cmpi ne, %20, %c0_i32_9 : i32
    scf.if %21 {
      %c0_i32_42 = arith.constant 0 : i32
      %148 = tpu.memref_slice %arg2[%arg0, %14, %c0_i32_42] : memref<2x24x256xf32, #tpu.memory_space<any>> -> memref<1x24x256xf32, #tpu.memory_space<any>>
      %149 = tpu.memref_squeeze %148 : memref<1x24x256xf32, #tpu.memory_space<any>> -> memref<24x256xf32, #tpu.memory_space<any>>
      %c0_i32_43 = arith.constant 0 : i32
      %c0_i32_44 = arith.constant 0 : i32
      %150 = tpu.memref_slice %arg6[%10, %c0_i32_43, %c0_i32_44] : memref<2x24x256xf32, #tpu.memory_space<vmem>> -> memref<1x24x256xf32, #tpu.memory_space<vmem>>
      %151 = tpu.memref_squeeze %150 : memref<1x24x256xf32, #tpu.memory_space<vmem>> -> memref<24x256xf32, #tpu.memory_space<vmem>>
      %152 = tpu.memref_slice %arg7[%10] : memref<2x!tpu.dma_semaphore, #tpu.memory_space<semaphore_mem>> -> memref<1x!tpu.dma_semaphore, #tpu.memory_space<semaphore_mem>>
      %153 = tpu.memref_squeeze %152 : memref<1x!tpu.dma_semaphore, #tpu.memory_space<semaphore_mem>> -> memref<!tpu.dma_semaphore, #tpu.memory_space<semaphore_mem>>
      tpu.enqueue_dma source(%149 : memref<24x256xf32, #tpu.memory_space<any>>) target(%151 : memref<24x256xf32, #tpu.memory_space<vmem>>) target_semaphore(%153 : memref<!tpu.dma_semaphore, #tpu.memory_space<semaphore_mem>>)
    } else {
    }
    %c0_i32_10 = arith.constant 0 : i32
    %22 = tpu.memref_slice %arg2[%arg0, %12, %c0_i32_10] : memref<2x24x256xf32, #tpu.memory_space<any>> -> memref<1x24x256xf32, #tpu.memory_space<any>>
    %23 = tpu.memref_squeeze %22 : memref<1x24x256xf32, #tpu.memory_space<any>> -> memref<24x256xf32, #tpu.memory_space<any>>
    %c0_i32_11 = arith.constant 0 : i32
    %c0_i32_12 = arith.constant 0 : i32
    %24 = tpu.memref_slice %arg6[%9, %c0_i32_11, %c0_i32_12] : memref<2x24x256xf32, #tpu.memory_space<vmem>> -> memref<1x24x256xf32, #tpu.memory_space<vmem>>
    %25 = tpu.memref_squeeze %24 : memref<1x24x256xf32, #tpu.memory_space<vmem>> -> memref<24x256xf32, #tpu.memory_space<vmem>>
    %26 = tpu.memref_slice %arg7[%9] : memref<2x!tpu.dma_semaphore, #tpu.memory_space<semaphore_mem>> -> memref<1x!tpu.dma_semaphore, #tpu.memory_space<semaphore_mem>>
    %27 = tpu.memref_squeeze %26 : memref<1x!tpu.dma_semaphore, #tpu.memory_space<semaphore_mem>> -> memref<!tpu.dma_semaphore, #tpu.memory_space<semaphore_mem>>
    tpu.wait_dma2 semaphore(%27 : memref<!tpu.dma_semaphore, #tpu.memory_space<semaphore_mem>>) src(%23 : memref<24x256xf32, #tpu.memory_space<any>>) dst(%25 : memref<24x256xf32, #tpu.memory_space<vmem>>)
    %28 = arith.index_cast %9 : i32 to index
    %c0 = arith.constant 0 : index
    %c0_13 = arith.constant 0 : index
    %29 = vector.load %arg6[%28, %c0, %c0_13] : memref<2x24x256xf32, #tpu.memory_space<vmem>>, vector<1x24x256xf32>
    %30 = vector.shape_cast %29 : vector<1x24x256xf32> to vector<24x256xf32>
    %31 = vector.extract_strided_slice %30 {offsets = [0, 0], sizes = [24, 136], strides = [1, 1]} : vector<24x256xf32> to vector<24x136xf32>
    %32 = vector.extract_strided_slice %31 {offsets = [0, 0], sizes = [24, 132], strides = [1, 1]} : vector<24x136xf32> to vector<24x132xf32>
    %33 = vector.extract_strided_slice %31 {offsets = [0, 4], sizes = [24, 132], strides = [1, 1]} : vector<24x136xf32> to vector<24x132xf32>
    %34 = arith.addf %32, %33 : vector<24x132xf32>
    %35 = vector.extract_strided_slice %31 {offsets = [0, 1], sizes = [24, 132], strides = [1, 1]} : vector<24x136xf32> to vector<24x132xf32>
    %36 = vector.extract_strided_slice %31 {offsets = [0, 3], sizes = [24, 132], strides = [1, 1]} : vector<24x136xf32> to vector<24x132xf32>
    %37 = arith.addf %35, %36 : vector<24x132xf32>
    %38 = vector.extract_strided_slice %31 {offsets = [0, 2], sizes = [24, 132], strides = [1, 1]} : vector<24x136xf32> to vector<24x132xf32>
    %cst = arith.constant 0.00366300368 : f32
    %39 = vector.broadcast %cst : f32 to vector<24x132xf32>
    %40 = arith.mulf %39, %34 : vector<24x132xf32>
    %cst_14 = arith.constant 0.0146520147 : f32
    %41 = vector.broadcast %cst_14 : f32 to vector<24x132xf32>
    %42 = arith.mulf %41, %37 : vector<24x132xf32>
    %43 = arith.addf %40, %42 : vector<24x132xf32>
    %cst_15 = arith.constant 0.025641026 : f32
    %44 = vector.broadcast %cst_15 : f32 to vector<24x132xf32>
    %45 = arith.mulf %44, %38 : vector<24x132xf32>
    %46 = arith.addf %43, %45 : vector<24x132xf32>
    %cst_16 = arith.constant 0.0146520147 : f32
    %47 = vector.broadcast %cst_16 : f32 to vector<24x132xf32>
    %48 = arith.mulf %47, %34 : vector<24x132xf32>
    %cst_17 = arith.constant 0.0586080588 : f32
    %49 = vector.broadcast %cst_17 : f32 to vector<24x132xf32>
    %50 = arith.mulf %49, %37 : vector<24x132xf32>
    %51 = arith.addf %48, %50 : vector<24x132xf32>
    %cst_18 = arith.constant 0.095238097 : f32
    %52 = vector.broadcast %cst_18 : f32 to vector<24x132xf32>
    %53 = arith.mulf %52, %38 : vector<24x132xf32>
    %54 = arith.addf %51, %53 : vector<24x132xf32>
    %cst_19 = arith.constant 0.025641026 : f32
    %55 = vector.broadcast %cst_19 : f32 to vector<24x132xf32>
    %56 = arith.mulf %55, %34 : vector<24x132xf32>
    %cst_20 = arith.constant 0.095238097 : f32
    %57 = vector.broadcast %cst_20 : f32 to vector<24x132xf32>
    %58 = arith.mulf %57, %37 : vector<24x132xf32>
    %59 = arith.addf %56, %58 : vector<24x132xf32>
    %cst_21 = arith.constant 0.150183156 : f32
    %60 = vector.broadcast %cst_21 : f32 to vector<24x132xf32>
    %61 = arith.mulf %60, %38 : vector<24x132xf32>
    %62 = arith.addf %59, %61 : vector<24x132xf32>
    %63 = vector.extract_strided_slice %46 {offsets = [0, 0], sizes = [20, 132], strides = [1, 1]} : vector<24x132xf32> to vector<20x132xf32>
    %64 = vector.extract_strided_slice %46 {offsets = [4, 0], sizes = [20, 132], strides = [1, 1]} : vector<24x132xf32> to vector<20x132xf32>
    %65 = arith.addf %63, %64 : vector<20x132xf32>
    %66 = vector.extract_strided_slice %54 {offsets = [1, 0], sizes = [20, 132], strides = [1, 1]} : vector<24x132xf32> to vector<20x132xf32>
    %67 = vector.extract_strided_slice %54 {offsets = [3, 0], sizes = [20, 132], strides = [1, 1]} : vector<24x132xf32> to vector<20x132xf32>
    %68 = arith.addf %66, %67 : vector<20x132xf32>
    %69 = arith.addf %65, %68 : vector<20x132xf32>
    %70 = vector.extract_strided_slice %62 {offsets = [2, 0], sizes = [20, 132], strides = [1, 1]} : vector<24x132xf32> to vector<20x132xf32>
    %71 = arith.addf %69, %70 : vector<20x132xf32>
    %72 = vector.extract_strided_slice %71 {offsets = [0, 0], sizes = [18, 132], strides = [1, 1]} : vector<20x132xf32> to vector<18x132xf32>
    %73 = vector.extract_strided_slice %71 {offsets = [1, 0], sizes = [18, 132], strides = [1, 1]} : vector<20x132xf32> to vector<18x132xf32>
    %cst_22 = arith.constant 2.000000e+00 : f32
    %74 = vector.broadcast %cst_22 : f32 to vector<18x132xf32>
    %75 = arith.mulf %74, %73 : vector<18x132xf32>
    %76 = arith.addf %72, %75 : vector<18x132xf32>
    %77 = vector.extract_strided_slice %71 {offsets = [2, 0], sizes = [18, 132], strides = [1, 1]} : vector<20x132xf32> to vector<18x132xf32>
    %78 = arith.addf %76, %77 : vector<18x132xf32>
    %79 = vector.extract_strided_slice %78 {offsets = [0, 2], sizes = [18, 130], strides = [1, 1]} : vector<18x132xf32> to vector<18x130xf32>
    %80 = vector.extract_strided_slice %78 {offsets = [0, 0], sizes = [18, 130], strides = [1, 1]} : vector<18x132xf32> to vector<18x130xf32>
    %81 = arith.subf %79, %80 : vector<18x130xf32>
    %82 = vector.extract_strided_slice %71 {offsets = [0, 0], sizes = [20, 130], strides = [1, 1]} : vector<20x132xf32> to vector<20x130xf32>
    %83 = vector.extract_strided_slice %71 {offsets = [0, 1], sizes = [20, 130], strides = [1, 1]} : vector<20x132xf32> to vector<20x130xf32>
    %cst_23 = arith.constant 2.000000e+00 : f32
    %84 = vector.broadcast %cst_23 : f32 to vector<20x130xf32>
    %85 = arith.mulf %84, %83 : vector<20x130xf32>
    %86 = arith.addf %82, %85 : vector<20x130xf32>
    %87 = vector.extract_strided_slice %71 {offsets = [0, 2], sizes = [20, 130], strides = [1, 1]} : vector<20x132xf32> to vector<20x130xf32>
    %88 = arith.addf %86, %87 : vector<20x130xf32>
    %89 = vector.extract_strided_slice %88 {offsets = [2, 0], sizes = [18, 130], strides = [1, 1]} : vector<20x130xf32> to vector<18x130xf32>
    %90 = vector.extract_strided_slice %88 {offsets = [0, 0], sizes = [18, 130], strides = [1, 1]} : vector<20x130xf32> to vector<18x130xf32>
    %91 = arith.subf %89, %90 : vector<18x130xf32>
    %92 = arith.mulf %81, %81 : vector<18x130xf32>
    %93 = arith.mulf %91, %91 : vector<18x130xf32>
    %94 = arith.addf %92, %93 : vector<18x130xf32>
    %95 = vector.extract_strided_slice %94 {offsets = [0, 0], sizes = [18, 128], strides = [1, 1]} : vector<18x130xf32> to vector<18x128xf32>
    %96 = vector.extract_strided_slice %94 {offsets = [0, 1], sizes = [18, 128], strides = [1, 1]} : vector<18x130xf32> to vector<18x128xf32>
    %97 = vector.extract_strided_slice %94 {offsets = [0, 2], sizes = [18, 128], strides = [1, 1]} : vector<18x130xf32> to vector<18x128xf32>
    %98 = vector.extract_strided_slice %96 {offsets = [1, 0], sizes = [16, 128], strides = [1, 1]} : vector<18x128xf32> to vector<16x128xf32>
    %99 = vector.extract_strided_slice %95 {offsets = [1, 0], sizes = [16, 128], strides = [1, 1]} : vector<18x128xf32> to vector<16x128xf32>
    %100 = vector.extract_strided_slice %97 {offsets = [1, 0], sizes = [16, 128], strides = [1, 1]} : vector<18x128xf32> to vector<16x128xf32>
    %101 = vector.extract_strided_slice %96 {offsets = [0, 0], sizes = [16, 128], strides = [1, 1]} : vector<18x128xf32> to vector<16x128xf32>
    %102 = vector.extract_strided_slice %96 {offsets = [2, 0], sizes = [16, 128], strides = [1, 1]} : vector<18x128xf32> to vector<16x128xf32>
    %103 = vector.extract_strided_slice %95 {offsets = [0, 0], sizes = [16, 128], strides = [1, 1]} : vector<18x128xf32> to vector<16x128xf32>
    %104 = vector.extract_strided_slice %97 {offsets = [0, 0], sizes = [16, 128], strides = [1, 1]} : vector<18x128xf32> to vector<16x128xf32>
    %105 = vector.extract_strided_slice %95 {offsets = [2, 0], sizes = [16, 128], strides = [1, 1]} : vector<18x128xf32> to vector<16x128xf32>
    %106 = vector.extract_strided_slice %97 {offsets = [2, 0], sizes = [16, 128], strides = [1, 1]} : vector<18x128xf32> to vector<16x128xf32>
    %107 = vector.extract_strided_slice %81 {offsets = [1, 1], sizes = [16, 128], strides = [1, 1]} : vector<18x130xf32> to vector<16x128xf32>
    %108 = vector.extract_strided_slice %91 {offsets = [1, 1], sizes = [16, 128], strides = [1, 1]} : vector<18x130xf32> to vector<16x128xf32>
    %109 = math.absf %107 : vector<16x128xf32>
    %110 = math.absf %108 : vector<16x128xf32>
    %cst_24 = arith.constant 0.414213568 : f32
    %111 = vector.broadcast %cst_24 : f32 to vector<16x128xf32>
    %112 = arith.mulf %111, %109 : vector<16x128xf32>
    %113 = arith.cmpf ole, %110, %112 : vector<16x128xf32>
    %cst_25 = arith.constant 0.414213568 : f32
    %114 = vector.broadcast %cst_25 : f32 to vector<16x128xf32>
    %115 = arith.mulf %114, %110 : vector<16x128xf32>
    %116 = arith.cmpf ole, %109, %115 : vector<16x128xf32>
    %117 = arith.mulf %107, %108 : vector<16x128xf32>
    %cst_26 = arith.constant 0.000000e+00 : f32
    %118 = vector.broadcast %cst_26 : f32 to vector<16x128xf32>
    %119 = arith.cmpf ogt, %117, %118 : vector<16x128xf32>
    %120 = arith.select %119, %103, %104 : vector<16x128xi1>, vector<16x128xf32>
    %121 = arith.select %116, %101, %120 : vector<16x128xi1>, vector<16x128xf32>
    %122 = arith.select %113, %99, %121 : vector<16x128xi1>, vector<16x128xf32>
    %123 = arith.select %119, %106, %105 : vector<16x128xi1>, vector<16x128xf32>
    %124 = arith.select %116, %102, %123 : vector<16x128xi1>, vector<16x128xf32>
    %125 = arith.select %113, %100, %124 : vector<16x128xi1>, vector<16x128xf32>
    %126 = arith.cmpf oge, %98, %122 : vector<16x128xf32>
    %127 = arith.cmpf oge, %98, %125 : vector<16x128xf32>
    %128 = arith.andi %126, %127 : vector<16x128xi1>
    %cst_27 = arith.constant 0.00999999977 : f32
    %129 = vector.broadcast %cst_27 : f32 to vector<16x128xf32>
    %130 = arith.cmpf ogt, %98, %129 : vector<16x128xf32>
    %131 = arith.andi %128, %130 : vector<16x128xi1>
    %cst_28 = arith.constant 1.000000e-24 : f32
    %132 = vector.broadcast %cst_28 : f32 to vector<16x128xf32>
    %133 = arith.addf %98, %132 : vector<16x128xf32>
    %134 = math.rsqrt %133 : vector<16x128xf32>
    %135 = arith.extui %131 : vector<16x128xi1> to vector<16x128xi8>
    %c0_29 = arith.constant 0 : index
    %c0_30 = arith.constant 0 : index
    %c0_31 = arith.constant 0 : index
    %136 = vector.load %arg3[%c0_29, %c0_30, %c0_31] : memref<1x16x128xi8, #tpu.memory_space<vmem>>, vector<1x16x128xi8>
    %137 = vector.shape_cast %136 : vector<1x16x128xi8> to vector<16x128xi8>
    %138 = vector.shape_cast %135 : vector<16x128xi8> to vector<1x16x128xi8>
    tpu.vector_store %arg3[%c0_29, %c0_30, %c0_31], %138 {strides = array<i32>} : memref<1x16x128xi8, #tpu.memory_space<vmem>>, vector<1x16x128xi8>,
    %c0_32 = arith.constant 0 : index
    %c0_33 = arith.constant 0 : index
    %c0_34 = arith.constant 0 : index
    %c0_35 = arith.constant 0 : index
    %139 = vector.load %arg4[%c0_32, %c0_33, %c0_34, %c0_35] : memref<1x2x16x128xf32, #tpu.memory_space<vmem>>, vector<1x1x16x128xf32>
    %140 = vector.shape_cast %139 : vector<1x1x16x128xf32> to vector<16x128xf32>
    %141 = vector.shape_cast %107 : vector<16x128xf32> to vector<1x1x16x128xf32>
    tpu.vector_store %arg4[%c0_32, %c0_33, %c0_34, %c0_35], %141 {strides = array<i32>} : memref<1x2x16x128xf32, #tpu.memory_space<vmem>>, vector<1x1x16x128xf32>,
    %c0_36 = arith.constant 0 : index
    %c1 = arith.constant 1 : index
    %c0_37 = arith.constant 0 : index
    %c0_38 = arith.constant 0 : index
    %142 = vector.load %arg4[%c0_36, %c1, %c0_37, %c0_38] : memref<1x2x16x128xf32, #tpu.memory_space<vmem>>, vector<1x1x16x128xf32>
    %143 = vector.shape_cast %142 : vector<1x1x16x128xf32> to vector<16x128xf32>
    %144 = vector.shape_cast %108 : vector<16x128xf32> to vector<1x1x16x128xf32>
    tpu.vector_store %arg4[%c0_36, %c1, %c0_37, %c0_38], %144 {strides = array<i32>} : memref<1x2x16x128xf32, #tpu.memory_space<vmem>>, vector<1x1x16x128xf32>,
    %c0_39 = arith.constant 0 : index
    %c0_40 = arith.constant 0 : index
    %c0_41 = arith.constant 0 : index
    %145 = vector.load %arg5[%c0_39, %c0_40, %c0_41] : memref<1x16x128xf32, #tpu.memory_space<vmem>>, vector<1x16x128xf32>
    %146 = vector.shape_cast %145 : vector<1x16x128xf32> to vector<16x128xf32>
    %147 = vector.shape_cast %134 : vector<16x128xf32> to vector<1x16x128xf32>
    tpu.vector_store %arg5[%c0_39, %c0_40, %c0_41], %147 {strides = array<i32>} : memref<1x16x128xf32, #tpu.memory_space<vmem>>, vector<1x16x128xf32>,
    return
  }
  func.func @transform_1(%arg0: i32, %arg1: i32) -> (i32, i32, i32) {
    %c0_i32 = arith.constant 0 : i32
    %c0_i32_0 = arith.constant 0 : i32
    return %arg0, %arg1, %c0_i32 : i32, i32, i32
  }
  func.func @transform_2(%arg0: i32, %arg1: i32) -> (i32, i32, i32, i32) {
    %c0_i32 = arith.constant 0 : i32
    %c0_i32_0 = arith.constant 0 : i32
    %c0_i32_1 = arith.constant 0 : i32
    return %arg0, %c0_i32, %arg1, %c0_i32_0 : i32, i32, i32, i32
  }
  func.func @transform_3(%arg0: i32, %arg1: i32) -> (i32, i32, i32) {
    %c0_i32 = arith.constant 0 : i32
    %c0_i32_0 = arith.constant 0 : i32
    return %arg0, %arg1, %c0_i32 : i32, i32, i32
  }
}

</mosaic_0001>

<bundles_post_ra>
// kernel: _canny_front_end.1
= control target key start
LH: loop header
LB: loop body
LE: loop exit
PB: predicated region body
PF: predicated region fallthrough
CT: control target
= control target key end

     0   :  { %9 = vsyncpa [#allocation5], 0  ;;  %s3258_s0 = inlined_call_operand.vmem [shape: f32[2,24,256], index: 0, kind: input, shape index: {}]   ;;  %s3259_s1 = inlined_call_operand.hbm [shape: u8[2,16,128], index: 1, kind: output, shape index: {0}]   ;;  %s3260_s2 = inlined_call_operand.hbm [shape: f32[2,2,16,128], index: 2, kind: output, shape index: {1}]   ;;  %s3261_s3 = inlined_call_operand.hbm [shape: f32[2,16,128], index: 3, kind: output, shape index: {2}]  }
   0x1   :  { %11 = vsyncpa [#allocation5 + $0x1], 0 }
   0x2   :  { %12 = vsyncpa [#allocation7], 0 }
   0x3   :  { %14 = vsyncpa [#allocation7 + $0x1], 0  ;;  %s2124_s12 = smov 0   ;;  %s2126_s13 = smov 0  }
   0x4   :  { %s2128_s14 = smov 0   ;;  %s2130_s15 = smov 0  }
   0x5 LB: > { %s29_s16 = sadd.s32 1, %s2085_s14  ;;  %s1862_s17 = sadd.s32 4294967295, %s2089_s15   ;;  %s2089_s15 = sphi %s2130_s15, %s20_s15   ;;  %s2085_s14 = sphi %s2128_s14, %s3320_s14   ;;  %s2081_s13 = sphi %s2126_s13, %s3319_s13   ;;  %s2077_s12 = sphi %s2124_s12, %s3318_s12  }
   0x6   : > { %p31_p0 = scmp.ge.s32.totalorder %s29_s16, 2  ;;  %p47_p1 = scmp.ne.s32.totalorder %s2081_s13, %s2077_s12 }
   0x7   : > { %s38_s18 = sadd.s32 1, %s2081_s13  ;;  %p48_p2 = scmp.eq.s32.totalorder %s1862_s17, 1 }
   0x8   : > { %s3322_s16 = smov (%p31_p0, %s29_s16), 0  ;;  %p42_p3 = scmp.eq.s32.totalorder %s2089_s15, 1 }
   0x9   : > { %s33_s19 = ssub.s32 %s2085_s14, %s3322_s16  ;;  %p2156_p6 = por %p48_p2, %p47_p1 }
   0xa   : > { %p36_p4 = scmp.eq.s32.totalorder %s33_s19, 0  ;;  %p1863_p5 = scmp.ne.s32.totalorder %s33_s19, 0 }
   0xb   : > { %p1866_p8 = scmp.ge.s32.totalorder %s2089_s15, 2 }
   0xc   : > { %s2161_s21 = scalar_select %p36_p4, %s2081_s13, %s38_s18  }
   0xd   : > { %p2163_p7 = por %p1863_p5, %p42_p3  ;;  %99 = sbr.rel (%p1866_p8) target bundleno = 1198 (0x4ae), region = 12 }
  0x14   : > { %s2169_s23 = sand.u32 1, %s2081_s13   ;;  %s1888_s24 = smul.u32 48, %s2085_s14 }
  0x15   : > { %s1867_s25 = sshll.u32 %s2169_s23, 2  ;;  %s1868_s26 = sshll.u32 %s2169_s23, 5 }
  0x16   : > { %s1869_s27 = sshll.u32 %s2169_s23, 4  ;;  %s153_s30 = scalar_lea.vmem %s3258_s0, %s1888_s24 }
  0x17   : > { %v2178_v0 = vld [vmem:[%s153_s30] sm:$0xff]  ;;  %v2180_v1 = vld [vmem:[%s153_s30 + $0x8] sm:$0xff]  ;;  %v2182_v2 = vld [vmem:[%s153_s30 + $0x10] sm:$0xff]  ;;  %s2190_s4 = scalar_lea.vmem [#allocation4], %s1867_s25  ;;  %s2192_s5 = scalar_lea.vmem [#allocation6], %s1868_s26 }
  0x18   : > { %v2184_v3 = vld [vmem:[%s153_s30 + $0x18] sm:$0xff]  ;;  %v2186_v4 = vld [vmem:[%s153_s30 + $0x20] sm:$0xff]  ;;  %v2188_v5 = vld [vmem:[%s153_s30 + $0x28] sm:$0xff]  ;;  %s2194_s6 = scalar_lea.vmem [#allocation8], %s1869_s27 }
  0x19   : > { %209 = vsyncadd [#allocation3], 768  ;;  %s2091_s7 = smov 126  }
  0x1a   : > { %328 = vrot.lane.b32.xlu1 %v2182_v2, %s2091_s7  ;;  %324 = vrot.lane.b32.xlu0 %v2178_v0, %s2091_s7 }
  0x1e   : > { %330 = vrot.lane.b32.xlu1 %v2184_v3, %s2091_s7  ;;  %326 = vrot.lane.b32.xlu0 %v2180_v1, %s2091_s7 }
  0x1f   : > { %2065 = dma.done.wait [#allocation3], 768 }
  0x20   : > { %2066 = vsyncadd [#allocation3], 4294966528  ;;  %s2092_s8 = smov 124   ;;  %v483_v6 = vmul.f32 0.0952381, %v2180_v1  ;;  %vm336_vm0 = vcmask 1031168  }
  0x21   : > { %v482_v7 = vmul.f32 0.0952381, %v2178_v0  ;;  %v485_v8 = vmul.f32 0.0952381, %v2184_v3  ;;  %v484_v9 = vmul.f32 0.0952381, %v2182_v2 }
  0x22   : > { %334 = vrot.lane.b32.xlu1 %v2188_v5, %s2091_s7  ;;  %332 = vrot.lane.b32.xlu0 %v2186_v4, %s2091_s7  ;;  %v487_v10 = vmul.f32 0.0952381, %v2188_v5  ;;  %v486_v11 = vmul.f32 0.0952381, %v2186_v4  ;;  %v399_v12 = vmul.f32 0.025641026, %v2180_v1 }
  0x23   : > { %v398_v13 = vmul.f32 0.025641026, %v2178_v0  ;;  %v401_v14 = vmul.f32 0.025641026, %v2184_v3  ;;  %v400_v15 = vmul.f32 0.025641026, %v2182_v2 }
  0x24   : > { %v403_v16 = vmul.f32 0.025641026, %v2188_v5  ;;  %v402_v17 = vmul.f32 0.025641026, %v2186_v4  ;;  %v567_v18 = vmul.f32 0.15018316, %v2180_v1 }
  0x25   : > { %v566_v19 = vmul.f32 0.15018316, %v2178_v0  ;;  %v569_v20 = vmul.f32 0.15018316, %v2184_v3  ;;  %v568_v21 = vmul.f32 0.15018316, %v2182_v2 }
  0x26   : > { %298 = vrot.lane.b32.xlu1 %v2180_v1, %s2092_s8  ;;  %296 = vrot.lane.b32.xlu0 %v2178_v0, %s2092_s8  ;;  %s2093_s9 = smov 127   ;;  %v571_v55 = vmul.f32 0.15018316, %v2188_v5  ;;  %v570_v56 = vmul.f32 0.15018316, %v2186_v4  ;;  %vm308_vm1 = vcmask 1014784  }
  0x27   : > { %vm3274_vm2 = vcmask 1039360   ;;  %vm640_vm3 = vcmask 1045504   ;;  %vm611_vm4 = vcmask 1043456   ;;  %vm669_vm5 = vcmask 1046528   ;;  %s2094_s10 = smov 2   ;;  %s2095_s11 = smov 1  }
  0x28   : > { %vm876_vm6 = vcmask 1041408   ;;  %vm800_vm7 = vcmask 15360   ;;  %vm1117_vm8 = vcmask 1040384   ;;  %s2096_s18 = smov 125   ;;  %vm1136_vm9 = vcmask 7168   ;;  %s1644_s19 = sand.u32 1, %s2089_s15  }
  0x29   : > { %s1892_s24 = sshll.u32 %s2085_s14, 9  ;;  %s1683_s28 = sshll.u32 %s2192_s5, 4  ;;  %s3125_s28 = int_to_ptr.vmem [resolvable:$true] %s1683_s28 }
  0x2a   : > { %302 = vrot.lane.b32.xlu1 %v2184_v3, %s2092_s8  ;;  %300 = vrot.lane.b32.xlu0 %v2182_v2, %s2092_s8  ;;  %s3122_s27 = scalar_lea.hbm %s3260_s2, %s1892_s24  ;;  %s3131_s29 = scalar_lea.sflag [#allocation7], %s1644_s19 }
  0x2b   : > { %s1965_s30 = scalar_lea.vmem %s3125_s28, 512 }
  0x2c   : > { %p1966_p9 = scmp.ne.s32.totalorder %s3125_s28, %s1965_s30 }
  0x2e   : > { %306 = vrot.lane.b32.xlu1 %v2188_v5, %s2092_s8  ;;  %304 = vrot.lane.b32.xlu0 %v2186_v4, %s2092_s8  ;;  %p1967_p10 = pnand %p1966_p9, %p2163_p7 }
  0x30   : > { %p1968_p11 = pneg %p1967_p10 }
  0x32   : > { %496 = vrot.lane.b32.xlu1 %v483_v6, %s2091_s7  ;;  %494 = vrot.lane.b32.xlu0 %v482_v7, %s2091_s7 }
  0x36   : > { %500 = vrot.lane.b32.xlu1 %v485_v8, %s2091_s7  ;;  %498 = vrot.lane.b32.xlu0 %v484_v9, %s2091_s7 }
  0x3a   : > { %504 = vrot.lane.b32.xlu1 %v487_v10, %s2091_s7  ;;  %502 = vrot.lane.b32.xlu0 %v486_v11, %s2091_s7 }
  0x3e   : > { %412 = vrot.lane.b32.xlu1 %v399_v12, %s2091_s7  ;;  %410 = vrot.lane.b32.xlu0 %v398_v13, %s2091_s7 }
  0x42   : > { %416 = vrot.lane.b32.xlu1 %v401_v14, %s2091_s7  ;;  %414 = vrot.lane.b32.xlu0 %v400_v15, %s2091_s7 }
  0x46   : > { %420 = vrot.lane.b32.xlu1 %v403_v16, %s2091_s7  ;;  %418 = vrot.lane.b32.xlu0 %v402_v17, %s2091_s7 }
  0x4a   : > { %580 = vrot.lane.b32.xlu1 %v567_v18, %s2091_s7  ;;  %578 = vrot.lane.b32.xlu0 %v566_v19, %s2091_s7 }
  0x4e   : > { %584 = vrot.lane.b32.xlu1 %v569_v20, %s2091_s7  ;;  %582 = vrot.lane.b32.xlu0 %v568_v21, %s2091_s7 }
  0x8c   : > { %v329_v22 = vpop.permute.xlu1 %328  ;;  %v325_v23 = vpop.permute.xlu0 %324 }
  0x90   : > { %v331_v24 = vpop.permute.xlu1 %330  ;;  %v327_v25 = vpop.permute.xlu0 %326 }
  0x91   : > { %v338_v26 = vsel %vm336_vm0, %v329_v22, %v331_v24  ;;  %v349_v27 = vadd.f32 %v331_v24, %v2184_v3  ;;  %v337_v28 = vsel %vm336_vm0, %v325_v23, %v327_v25  ;;  %v347_v29 = vadd.f32 %v327_v25, %v2180_v1 }
  0x92   : > { %v346_v30 = vadd.f32 %v337_v28, %v2178_v0  ;;  %v348_v32 = vadd.f32 %v338_v26, %v2182_v2 }
  0x93   : > { %v444_v31 = vmul.f32 0.05860806, %v347_v29  ;;  %v446_v38 = vmul.f32 0.05860806, %v349_v27  ;;  %v359_v43 = vmul.f32 0.014652015, %v347_v29 }
  0x94   : > { %v443_v33 = vmul.f32 0.05860806, %v346_v30  ;;  %v335_v34 = vpop.permute.xlu1 %334  ;;  %v333_v35 = vpop.permute.xlu0 %332  ;;  %v445_v40 = vmul.f32 0.05860806, %v348_v32  ;;  %v358_v44 = vmul.f32 0.014652015, %v346_v30 }
  0x95   : > { %457 = vrot.lane.b32.xlu1 %v444_v31, %s2093_s9  ;;  %v351_v36 = vadd.f32 %v335_v34, %v2188_v5  ;;  %v339_v37 = vsel %vm336_vm0, %v333_v35, %v335_v34  ;;  %v361_v45 = vmul.f32 0.014652015, %v349_v27  ;;  %v360_v46 = vmul.f32 0.014652015, %v348_v32 }
  0x96   : > { %455 = vrot.lane.b32.xlu0 %v443_v33, %s2093_s9  ;;  %v350_v39 = vadd.f32 %v339_v37, %v2186_v4  ;;  %v528_v49 = vmul.f32 0.0952381, %v347_v29  ;;  %v527_v50 = vmul.f32 0.0952381, %v346_v30  ;;  %v530_v51 = vmul.f32 0.0952381, %v349_v27 }
  0x97   : > { %v448_v41 = vmul.f32 0.05860806, %v351_v36  ;;  %v363_v47 = vmul.f32 0.014652015, %v351_v36  ;;  %v529_v52 = vmul.f32 0.0952381, %v348_v32 }
  0x98   : > { %v447_v42 = vmul.f32 0.05860806, %v350_v39  ;;  %v362_v48 = vmul.f32 0.014652015, %v350_v39  ;;  %v532_v53 = vmul.f32 0.0952381, %v351_v36  ;;  %v299_v57 = vpop.permute.xlu1 %298  ;;  %v297_v58 = vpop.permute.xlu0 %296 }
  0x99   : > { %461 = vrot.lane.b32.xlu1 %v446_v38, %s2093_s9  ;;  %v531_v54 = vmul.f32 0.0952381, %v350_v39  ;;  %v319_v26 = vadd.f32 %v299_v57, %v2180_v1  ;;  %v309_v29 = vsel %vm308_vm1, %v297_v58, %v299_v57 }
  0x9a   : > { %459 = vrot.lane.b32.xlu0 %v445_v40, %s2093_s9  ;;  %v318_v36 = vadd.f32 %v309_v29, %v2178_v0 }
  0x9b   : > { %v438_v34 = vmul.f32 0.014652015, %v319_v26 }
  0x9c   : > { %v303_v59 = vpop.permute.xlu1 %302  ;;  %v301_v60 = vpop.permute.xlu0 %300 }
  0x9d   : > { %465 = vrot.lane.b32.xlu1 %v448_v41, %s2093_s9  ;;  %v321_v24 = vadd.f32 %v303_v59, %v2184_v3  ;;  %v310_v27 = vsel %vm308_vm1, %v301_v60, %v303_v59  ;;  %v2324_v59 = vmul.f32 0.025641026, %v318_v36 }
  0x9e   : > { %463 = vrot.lane.b32.xlu0 %v447_v42, %s2093_s9  ;;  %v320_v32 = vadd.f32 %v310_v27, %v2182_v2 }
  0x9f   : > { %v440_v30 = vmul.f32 0.014652015, %v321_v24  ;;  %v355_v57 = vmul.f32 0.0036630037, %v321_v24 }
  0xa0   : > { %v307_v61 = vpop.permute.xlu1 %306  ;;  %v305_v62 = vpop.permute.xlu0 %304  ;;  %v439_v40 = vmul.f32 0.014652015, %v320_v32  ;;  %v523_v29 = vmul.f32 0.025641026, %v320_v32 }
  0xa1   : > { %372 = vrot.lane.b32.xlu1 %v359_v43, %s2093_s9  ;;  %v323_v33 = vadd.f32 %v307_v61, %v2188_v5  ;;  %v311_v37 = vsel %vm308_vm1, %v305_v62, %v307_v61  ;;  %v437_v5 = vmul.f32 0.014652015, %v318_v36 }
  0xa2   : > { %370 = vrot.lane.b32.xlu0 %v358_v44, %s2093_s9  ;;  %v322_v42 = vadd.f32 %v311_v37, %v2186_v4 }
  0xa3   : > { %v442_v41 = vmul.f32 0.014652015, %v323_v33 }
  0xa4   : > { %v2277_v63 = vpop.permute.xlu1 %496  ;;  %v2279_v6 = vpop.permute.xlu0 %494 }
  0xa5   : > { %376 = vrot.lane.b32.xlu1 %v361_v45, %s2093_s9  ;;  %v506_v60 = vsel %vm336_vm0, %v2279_v6, %v2277_v63 }
  0xa6   : > { %374 = vrot.lane.b32.xlu0 %v360_v46, %s2093_s9 }
  0xa8   : > { %v501_v7 = vpop.permute.xlu1 %500  ;;  %v499_v8 = vpop.permute.xlu0 %498 }
  0xa9   : > { %380 = vrot.lane.b32.xlu1 %v363_v47, %s2093_s9 }
  0xaa   : > { %378 = vrot.lane.b32.xlu0 %v362_v48, %s2093_s9 }
  0xac   : > { %v2281_v9 = vpop.permute.xlu1 %504  ;;  %v2283_v10 = vpop.permute.xlu0 %502 }
  0xad   : > { %541 = vrot.lane.b32.xlu1 %v528_v49, %s2093_s9 }
  0xae   : > { %539 = vrot.lane.b32.xlu0 %v527_v50, %s2093_s9  ;;  %v353_v50 = vmul.f32 0.0036630037, %v319_v26 }
  0xb0   : > { %v2285_v11 = vpop.permute.xlu1 %412  ;;  %v2287_v12 = vpop.permute.xlu0 %410 }
  0xb1   : > { %545 = vrot.lane.b32.xlu1 %v530_v51, %s2093_s9  ;;  %v352_v51 = vmul.f32 0.0036630037, %v318_v36 }
  0xb2   : > { %543 = vrot.lane.b32.xlu0 %v529_v52, %s2093_s9  ;;  %v507_v52 = vsel %vm336_vm0, %v499_v8, %v501_v7 }
  0xb4   : > { %v2289_v13 = vpop.permute.xlu1 %416  ;;  %v2291_v14 = vpop.permute.xlu0 %414 }
  0xb5   : > { %549 = vrot.lane.b32.xlu1 %v532_v53, %s2093_s9  ;;  %v441_v53 = vmul.f32 0.014652015, %v322_v42 }
  0xb6   : > { %547 = vrot.lane.b32.xlu0 %v531_v54, %s2093_s9  ;;  %v2319_v54 = vmul.f32 0.025641026, %v319_v26 }
  0xb8   : > { %v2293_v15 = vpop.permute.xlu1 %420  ;;  %v2295_v16 = vpop.permute.xlu0 %418 }
  0xb9   : > { %588 = vrot.lane.b32.xlu1 %v571_v55, %s2091_s7 }
  0xba   : > { %586 = vrot.lane.b32.xlu0 %v570_v56, %s2091_s7 }
  0xbc   : > { %v2297_v17 = vpop.permute.xlu1 %580  ;;  %v2299_v18 = vpop.permute.xlu0 %578 }
  0xc0   : > { %v2301_v19 = vpop.permute.xlu1 %584  ;;  %v2303_v20 = vpop.permute.xlu0 %582 }
 0x107   : > { %v458_v21 = vpop.permute.xlu1 %457 }
 0x108   : > { %v456_v22 = vpop.permute.xlu0 %455  ;;  %v477_v38 = vadd.f32 %v458_v21, %v438_v34  ;;  %v526_v34 = vmul.f32 0.025641026, %v323_v33 }
 0x109   : > { %v467_v43 = vsel %vm3274_vm2, %v456_v22, %v458_v21  ;;  %v354_v22 = vmul.f32 0.0036630037, %v320_v32 }
 0x10a   : > { %v516_v0 = vadd.f32 %v2277_v63, %v477_v38  ;;  %v476_v48 = vadd.f32 %v467_v43, %v437_v5 }
 0x10b   : > { %v462_v23 = vpop.permute.xlu1 %461 }
 0x10c   : > { %v460_v25 = vpop.permute.xlu0 %459  ;;  %v479_v35 = vadd.f32 %v462_v23, %v440_v30  ;;  %v644_v61 = vrot.slane %v516_v0, 2  ;;  %v515_v21 = vadd.f32 %v506_v60, %v476_v48  ;;  %v508_v30 = vsel %vm336_vm0, %v2283_v10, %v2281_v9 }
 0x10d   : > { %v468_v39 = vsel %vm3274_vm2, %v460_v25, %v462_v23  ;;  %v524_v25 = vmul.f32 0.025641026, %v321_v24  ;;  %v525_v24 = vmul.f32 0.025641026, %v322_v42  ;;  %v423_v10 = vsel %vm336_vm0, %v2291_v14, %v2289_v13 }
 0x10e   : > { %v2313_v2 = vadd.f32 %v501_v7, %v479_v35  ;;  %v478_v44 = vadd.f32 %v468_v39, %v439_v40  ;;  %v357_v7 = vmul.f32 0.0036630037, %v323_v33  ;;  %v641_v39 = vrot.slane %v515_v21, 2 }
 0x10f   : > { %v466_v28 = vpop.permute.xlu1 %465 }
 0x110   : > { %v464_v31 = vpop.permute.xlu0 %463  ;;  %v481_v45 = vadd.f32 %v466_v28, %v442_v41  ;;  %v645_v4 = vrot.slane %v2313_v2, 2  ;;  %v2321_v55 = vadd.f32 %v507_v52, %v478_v44 }
 0x111   : > { %v469_v49 = vsel %vm3274_vm2, %v464_v31, %v466_v28  ;;  %v356_v28 = vmul.f32 0.0036630037, %v322_v42  ;;  %v424_v42 = vsel %vm336_vm0, %v2295_v16, %v2293_v15 }
 0x112   : > { %v520_v56 = vadd.f32 %v2281_v9, %v481_v45  ;;  %v480_v62 = vadd.f32 %v469_v49, %v441_v53  ;;  %v646_v26 = vsel %vm640_vm3, %v644_v61, %v645_v4  ;;  %v642_v63 = vrot.slane %v2321_v55, 2 }
 0x113   : > { %v373_v3 = vpop.permute.xlu1 %372  ;;  %v2336_v40 = vadd.f32 %v646_v26, %v516_v0  ;;  %v422_v9 = vsel %vm336_vm0, %v2287_v12, %v2285_v11 }
 0x114   : > { %v371_v1 = vpop.permute.xlu0 %370  ;;  %v649_v6 = vrot.slane %v520_v56, 2  ;;  %v519_v35 = vadd.f32 %v508_v30, %v480_v62  ;;  %v393_v33 = vadd.f32 %v373_v3, %v353_v50 }
 0x115   : > { %v383_v32 = vsel %vm3274_vm2, %v371_v1, %v373_v3  ;;  %v643_v1 = vsel %vm640_vm3, %v641_v39, %v642_v63  ;;  %v673_v16 = vrot.slane %v2336_v40, 1 }
 0x116   : > { %v2352_v5 = vadd.f32 %v649_v6, %v520_v56  ;;  %v650_v12 = vsel %vm640_vm3, %v645_v4, %v649_v6  ;;  %v392_v0 = vadd.f32 %v383_v32, %v352_v51  ;;  %v2367_v49 = vadd.f32 %v643_v1, %v515_v21 }
 0x117   : > { %v377_v46 = vpop.permute.xlu1 %376  ;;  %v432_v50 = vadd.f32 %v2285_v11, %v393_v33  ;;  %v2373_v4 = vadd.f32 %v650_v12, %v2313_v2 }
 0x118   : > { %v375_v47 = vpop.permute.xlu0 %374  ;;  %v395_v41 = vadd.f32 %v377_v46, %v355_v57 }
 0x119   : > { %v384_v36 = vsel %vm3274_vm2, %v375_v47, %v377_v46  ;;  %v647_v46 = vrot.slane %v519_v35, 2  ;;  %v590_v47 = vsel %vm336_vm0, %v2299_v18, %v2297_v17  ;;  %v678_v18 = vrot.slane %v2352_v5, 1 }
 0x11a   : > { %v394_v44 = vadd.f32 %v384_v36, %v354_v22  ;;  %v2365_v48 = vadd.f32 %v2289_v13, %v395_v41  ;;  %v431_v13 = vadd.f32 %v422_v9, %v392_v0  ;;  %v615_v21 = vrot.slane %v432_v50, 4 }
 0x11b   : > { %v381_v58 = vpop.permute.xlu1 %380  ;;  %v648_v57 = vsel %vm640_vm3, %v642_v63, %v647_v46  ;;  %v674_v39 = vrot.slane %v2373_v4, 1 }
 0x11c   : > { %v379_v8 = vpop.permute.xlu0 %378  ;;  %v397_v27 = vadd.f32 %v381_v58, %v357_v7  ;;  %v433_v53 = vadd.f32 %v423_v10, %v394_v44  ;;  %v616_v61 = vrot.slane %v2365_v48, 4  ;;  %v612_v63 = vrot.slane %v431_v13, 4 }
 0x11d   : > { %v385_v23 = vsel %vm3274_vm2, %v379_v8, %v381_v58  ;;  %v661_v8 = vadd.f32 %v647_v46, %v519_v35  ;;  %v670_v44 = vrot.slane %v2367_v49, 1 }
 0x11e   : > { %v396_v37 = vadd.f32 %v385_v23, %v356_v28  ;;  %v2346_v43 = vadd.f32 %v2293_v15, %v397_v27  ;;  %v591_v15 = vsel %vm336_vm0, %v2303_v20, %v2301_v19  ;;  %v613_v26 = vrot.slane %v433_v53, 4 }
 0x11f   : > { %v542_v31 = vpop.permute.xlu1 %541  ;;  %v617_v35 = vsel %vm611_vm4, %v615_v21, %v616_v61 }
 0x120   : > { %v540_v38 = vpop.permute.xlu0 %539  ;;  %v2355_v14 = vadd.f32 %v424_v42, %v396_v37  ;;  %v620_v51 = vrot.slane %v2346_v43, 4  ;;  %v561_v62 = vadd.f32 %v542_v31, %v2319_v54  ;;  %v614_v40 = vsel %vm611_vm4, %v612_v63, %v613_v26 }
 0x121   : > { %v551_v60 = vsel %vm3274_vm2, %v540_v38, %v542_v31  ;;  %v629_v41 = vadd.f32 %v617_v35, %v432_v50 }
 0x122   : > { %v618_v58 = vrot.slane %v2355_v14, 4  ;;  %v633_v22 = vadd.f32 %v620_v51, %v2346_v43  ;;  %v560_v27 = vadd.f32 %v551_v60, %v2324_v59  ;;  %v600_v36 = vadd.f32 %v2297_v17, %v561_v62 }
 0x123   : > { %v546_v45 = vpop.permute.xlu1 %545  ;;  %v621_v43 = vsel %vm611_vm4, %v616_v61, %v620_v51 }
 0x124   : > { %v544_v3 = vpop.permute.xlu0 %543  ;;  %v563_v20 = vadd.f32 %v546_v45, %v524_v25  ;;  %v659_v25 = vadd.f32 %v648_v57, %v2321_v55  ;;  %v632_v6 = vadd.f32 %v618_v58, %v2355_v14  ;;  %v676_v55 = vrot.slane %v661_v8, 1 }
 0x125   : > { %v552_v52 = vsel %vm3274_vm2, %v544_v3, %v546_v45  ;;  %v691_v59 = vadd.f32 %v678_v18, %v633_v22  ;;  %v701_v42 = vrot.slane %v600_v36, 2  ;;  %v628_v45 = vadd.f32 %v614_v40, %v431_v13 }
 0x126   : > { %v562_v2 = vadd.f32 %v552_v52, %v523_v29  ;;  %v602_v28 = vadd.f32 %v2301_v19, %v563_v20  ;;  %v690_v10 = vadd.f32 %v676_v55, %v632_v6  ;;  %v671_v33 = vrot.slane %v659_v25, 1 }
 0x127   : > { %v550_v56 = vpop.permute.xlu1 %549  ;;  %v619_v0 = vsel %vm611_vm4, %v613_v26, %v618_v58  ;;  %v675_v3 = vsel %vm669_vm5, %v673_v16, %v674_v39  ;;  %v679_v16 = vsel %vm669_vm5, %v674_v39, %v678_v18 }
 0x128   : > { %v548_v11 = vpop.permute.xlu0 %547  ;;  %v565_v23 = vadd.f32 %v550_v56, %v526_v34  ;;  %v601_v37 = vadd.f32 %v591_v15, %v562_v2  ;;  %v702_v32 = vrot.slane %v602_v28, 2  ;;  %v631_v15 = vadd.f32 %v621_v43, %v2365_v48 }
 0x129   : > { %v553_v7 = vsel %vm3274_vm2, %v548_v11, %v550_v56  ;;  %v687_v50 = vadd.f32 %v675_v3, %v629_v41  ;;  %v672_v49 = vsel %vm669_vm5, %v670_v44, %v671_v33  ;;  %v630_v4 = vadd.f32 %v619_v0, %v433_v53 }
 0x12a   : > { %v564_v54 = vadd.f32 %v553_v7, %v525_v24  ;;  %v599_v24 = vadd.f32 %v590_v47, %v560_v27  ;;  %v699_v1 = vrot.slane %v601_v37, 2  ;;  %v703_v47 = vsel %vm640_vm3, %v701_v42, %v702_v32 }
 0x12b   : > { %v589_v30 = vpop.permute.xlu1 %588  ;;  %v2409_v20 = vadd.f32 %v703_v47, %v687_v50  ;;  %v686_v56 = vadd.f32 %v672_v49, %v628_v45  ;;  %v689_v13 = vadd.f32 %v679_v16, %v631_v15  ;;  %v677_v58 = vsel %vm669_vm5, %v671_v33, %v676_v55 }
 0x12c   : > { %v604_v29 = vadd.f32 %v589_v30, %v565_v23  ;;  %v587_v31 = vpop.permute.xlu0 %586  ;;  %v698_v14 = vrot.slane %v599_v24, 2  ;;  %v688_v11 = vadd.f32 %v677_v58, %v630_v4 }
 0x12d   : > { %v592_v34 = vsel %vm336_vm0, %v587_v31, %v589_v30  ;;  %v721_v18 = vmul.f32 2.0, %v2409_v20  ;;  %v763_v35 = vrot.slane %v2409_v20, 2 }
 0x12e   : > { %v706_v38 = vrot.slane %v604_v29, 2  ;;  %v603_v19 = vadd.f32 %v592_v34, %v564_v54  ;;  %v700_v52 = vsel %vm640_vm3, %v698_v14, %v699_v1 }
 0x12f   : > { %v2416_v57 = vadd.f32 %v700_v52, %v686_v56  ;;  %v735_v22 = vrot.slane %v721_v18, 1 }
 0x130   : > { %v2394_v9 = vadd.f32 %v706_v38, %v691_v59  ;;  %v704_v17 = vrot.slane %v603_v19, 2  ;;  %v707_v48 = vsel %vm640_vm3, %v702_v32, %v706_v38 }
 0x131   : > { %v2422_v60 = vadd.f32 %v707_v48, %v689_v13  ;;  %v720_v62 = vmul.f32 2.0, %v2416_v57  ;;  %v760_v38 = vrot.slane %v2416_v57, 2 }
 0x132   : > { %v2398_v12 = vadd.f32 %v704_v17, %v690_v10  ;;  %v725_v46 = vmul.f32 2.0, %v2394_v9  ;;  %v705_v53 = vsel %vm640_vm3, %v699_v1, %v704_v17  ;;  %v768_v28 = vrot.slane %v2394_v9, 2 }
 0x133   : > { %v2426_v5 = vadd.f32 %v705_v53, %v688_v11  ;;  %v723_v61 = vmul.f32 2.0, %v2422_v60  ;;  %v732_v26 = vrot.slane %v720_v62, 1  ;;  %v764_v63 = vrot.slane %v2422_v60, 2 }
 0x134   : > { %826 = vrot.lane.b32.xlu1 %v725_v46, %s2093_s9  ;;  %v724_v51 = vmul.f32 2.0, %v2398_v12  ;;  %v740_v7 = vrot.slane %v725_v46, 1  ;;  %v766_v29 = vrot.slane %v2398_v12, 2 }
 0x135   : > { %v722_v2 = vmul.f32 2.0, %v2426_v5  ;;  %v736_v8 = vrot.slane %v723_v61, 1  ;;  %v761_v36 = vrot.slane %v2426_v5, 2  ;;  %v765_v59 = vsel %vm640_vm3, %v763_v35, %v764_v63 }
 0x136   : > { %824 = vrot.lane.b32.xlu0 %v724_v51, %s2093_s9  ;;  %v738_v21 = vrot.slane %v724_v51, 1  ;;  %v753_v25 = vadd.f32 %v740_v7, %v2394_v9  ;;  %v769_v10 = vsel %vm640_vm3, %v764_v63, %v768_v28 }
 0x137   : > { %v733_v23 = vrot.slane %v722_v2, 1  ;;  %v737_v27 = vsel %vm669_vm5, %v735_v22, %v736_v8  ;;  %v741_v37 = vsel %vm669_vm5, %v736_v8, %v740_v7  ;;  %v762_v24 = vsel %vm640_vm3, %v760_v38, %v761_v36 }
 0x138   : > { %845 = vrot.lane.b32.xlu1 %v2409_v20, %s2091_s7  ;;  %v752_v30 = vadd.f32 %v738_v21, %v2398_v12  ;;  %v2450_v54 = vadd.f32 %v768_v28, %v753_v25  ;;  %v749_v31 = vadd.f32 %v737_v27, %v2409_v20  ;;  %v751_v40 = vadd.f32 %v741_v37, %v2422_v60 }
 0x139   : > { %v734_v6 = vsel %vm669_vm5, %v732_v26, %v733_v23  ;;  %v739_v19 = vsel %vm669_vm5, %v733_v23, %v738_v21  ;;  %v767_v33 = vsel %vm640_vm3, %v761_v36, %v766_v29 }
 0x13a   : > { %843 = vrot.lane.b32.xlu0 %v2416_v57, %s2091_s7  ;;  %v2459_v34 = vadd.f32 %v766_v29, %v752_v30  ;;  %v748_v55 = vadd.f32 %v734_v6, %v2416_v57  ;;  %v2467_v39 = vadd.f32 %v765_v59, %v749_v31  ;;  %v750_v41 = vadd.f32 %v739_v19, %v2426_v5 }
 0x13b   : > { %v2479_v17 = vadd.f32 %v769_v10, %v751_v40 }
 0x13c   : > { %849 = vrot.lane.b32.xlu1 %v2422_v60, %s2091_s7  ;;  %v2473_v32 = vadd.f32 %v762_v24, %v748_v55  ;;  %v2484_v43 = vadd.f32 %v767_v33, %v750_v41 }
 0x13e   : > { %847 = vrot.lane.b32.xlu0 %v2426_v5, %s2091_s7 }
 0x140   : > { %818 = vrot.lane.b32.xlu1 %v721_v18, %s2093_s9 }
 0x142   : > { %816 = vrot.lane.b32.xlu0 %v720_v62, %s2093_s9 }
 0x144   : > { %822 = vrot.lane.b32.xlu1 %v723_v61, %s2093_s9 }
 0x146   : > { %820 = vrot.lane.b32.xlu0 %v722_v2, %s2093_s9 }
 0x148   : > { %853 = vrot.lane.b32.xlu1 %v2394_v9, %s2091_s7 }
 0x14a   : > { %851 = vrot.lane.b32.xlu0 %v2398_v12, %s2091_s7 }
 0x14c   : > { %798 = vrot.lane.b32.xlu1 %v2450_v54, %s2094_s10 }
 0x14e   : > { %796 = vrot.lane.b32.xlu0 %v2459_v34, %s2094_s10 }
 0x150   : > { %790 = vrot.lane.b32.xlu1 %v2467_v39, %s2094_s10 }
 0x152   : > { %788 = vrot.lane.b32.xlu0 %v2473_v32, %s2094_s10 }
 0x154   : > { %794 = vrot.lane.b32.xlu1 %v2479_v17, %s2094_s10 }
 0x156   : > { %792 = vrot.lane.b32.xlu0 %v2484_v43, %s2094_s10 }
 0x1a6   : > { %v827_v42 = vpop.permute.xlu1 %826 }
 0x1a7   : > { %v842_v13 = vadd.f32 %v827_v42, %v2394_v9 }
 0x1a8   : > { %v825_v1 = vpop.permute.xlu0 %824 }
 0x1a9   : > { %v830_v58 = vsel %vm3274_vm2, %v825_v1, %v827_v42 }
 0x1aa   : > { %v846_v44 = vpop.permute.xlu1 %845  ;;  %v841_v7 = vadd.f32 %v830_v58, %v2398_v12 }
 0x1ac   : > { %v844_v45 = vpop.permute.xlu0 %843 }
 0x1ad   : > { %v855_v52 = vsel %vm336_vm0, %v844_v45, %v846_v44 }
 0x1ae   : > { %v850_v46 = vpop.permute.xlu1 %849 }
 0x1b0   : > { %v848_v0 = vpop.permute.xlu0 %847 }
 0x1b1   : > { %v856_v11 = vsel %vm336_vm0, %v848_v0, %v850_v46 }
 0x1b2   : > { %v819_v14 = vpop.permute.xlu1 %818 }
 0x1b3   : > { %v838_v3 = vadd.f32 %v819_v14, %v2409_v20 }
 0x1b4   : > { %v817_v47 = vpop.permute.xlu0 %816 }
 0x1b5   : > { %v865_v15 = vadd.f32 %v846_v44, %v838_v3  ;;  %v828_v50 = vsel %vm3274_vm2, %v817_v47, %v819_v14 }
 0x1b6   : > { %v837_v51 = vadd.f32 %v828_v50, %v2416_v57  ;;  %v823_v49 = vpop.permute.xlu1 %822 }
 0x1b7   : > { %v878_v4 = vrot.slane %v865_v15, 6  ;;  %v840_v56 = vadd.f32 %v823_v49, %v2422_v60 }
 0x1b8   : > { %v864_v16 = vadd.f32 %v855_v52, %v837_v51  ;;  %v821_v48 = vpop.permute.xlu0 %820 }
 0x1b9   : > { %v867_v53 = vadd.f32 %v850_v46, %v840_v56  ;;  %v829_v20 = vsel %vm3274_vm2, %v821_v48, %v823_v49  ;;  %v2498_v61 = vsub.f32 %v865_v15, %v878_v4 }
 0x1ba   : > { %v839_v57 = vadd.f32 %v829_v20, %v2426_v5  ;;  %v854_v18 = vpop.permute.xlu1 %853  ;;  %v877_v62 = vrot.slane %v864_v16, 6 }
 0x1bb   : > { %v881_v2 = vrot.slane %v867_v53, 6  ;;  %v869_v60 = vadd.f32 %v854_v18, %v842_v13  ;;  %v1073_v30 = vrot.slane %v2498_v61, 2  ;;  %v906_v42 = vmul.f32 %v2498_v61, %v2498_v61 }
 0x1bc   : > { %v866_v8 = vadd.f32 %v856_v11, %v839_v57  ;;  %v852_v9 = vpop.permute.xlu0 %851  ;;  %v2505_v5 = vsub.f32 %v864_v16, %v877_v62  ;;  %v3267_v49 = vand.u32 2147483647, %v2498_v61 }
 0x1bd   : > { %v882_v21 = vsel %vm876_vm6, %v878_v4, %v881_v2  ;;  %v885_v22 = vrot.slane %v869_v60, 6  ;;  %v857_v23 = vsel %vm336_vm0, %v852_v9, %v854_v18  ;;  %v920_v3 = vrot.slane %v906_v42, 2 }
 0x1be   : > { %v2503_v25 = vsub.f32 %v867_v53, %v882_v21  ;;  %v879_v26 = vrot.slane %v866_v8, 6  ;;  %v868_v27 = vadd.f32 %v857_v23, %v841_v7  ;;  %v1070_v59 = vrot.slane %v2505_v5, 2 }
 0x1bf   : > { %v886_v28 = vsel %vm876_vm6, %v881_v2, %v885_v22  ;;  %v905_v0 = vmul.f32 %v2505_v5, %v2505_v5  ;;  %v1016_v48 = vmul.f32 0.41421357, %v3267_v49  ;;  %v3266_v57 = vand.u32 2147483647, %v2505_v5 }
 0x1c0   : > { %v880_v63 = vsel %vm876_vm6, %v877_v62, %v879_v26  ;;  %v2510_v12 = vsub.f32 %v869_v60, %v886_v28  ;;  %v883_v6 = vrot.slane %v868_v27, 6  ;;  %v1074_v29 = vrot.slane %v2503_v25, 2  ;;  %v799_v28 = vpop.permute.xlu1 %798 }
 0x1c1   : > { %v2513_v31 = vsub.f32 %v866_v8, %v880_v63  ;;  %v908_v10 = vmul.f32 %v2503_v25, %v2503_v25  ;;  %v3264_v50 = vand.u32 2147483647, %v2503_v25  ;;  %v917_v51 = vrot.slane %v905_v0, 2 }
 0x1c2   : > { %v884_v35 = vsel %vm876_vm6, %v879_v26, %v883_v6  ;;  %v1075_v36 = vsel %vm640_vm3, %v1073_v30, %v1074_v29  ;;  %v1078_v37 = vrot.slane %v2510_v12, 2  ;;  %v910_v24 = vmul.f32 %v2510_v12, %v2510_v12  ;;  %v797_v30 = vpop.permute.xlu0 %796 }
 0x1c3   : > { %v2518_v55 = vsub.f32 %v868_v27, %v884_v35  ;;  %1082 = vrot.lane.b32.xlu1 %v1075_v36, %s2094_s10  ;;  %v1071_v38 = vrot.slane %v2513_v31, 2  ;;  %v907_v45 = vmul.f32 %v2513_v31, %v2513_v31  ;;  %v921_v46 = vrot.slane %v908_v10, 2 }
 0x1c4   : > { %v1079_v41 = vsel %vm640_vm3, %v1074_v29, %v1078_v37  ;;  %v925_v44 = vrot.slane %v910_v24, 2  ;;  %v1018_v56 = vmul.f32 0.41421357, %v3264_v50  ;;  %v3263_v16 = vand.u32 2147483647, %v2510_v12  ;;  %v791_v63 = vpop.permute.xlu1 %790 }
 0x1c5   : > { %v1072_v19 = vsel %vm640_vm3, %v1070_v59, %v1071_v38  ;;  %v1076_v40 = vrot.slane %v2518_v55, 2  ;;  %v909_v33 = vmul.f32 %v2518_v55, %v2518_v55  ;;  %v918_v47 = vrot.slane %v907_v45, 2 }
 0x1c6   : > { %1080 = vrot.lane.b32.xlu0 %v1072_v19, %s2094_s10  ;;  %v922_v15 = vsel %vm640_vm3, %v920_v3, %v921_v46  ;;  %v926_v4 = vsel %vm640_vm3, %v921_v46, %v925_v44  ;;  %v3262_v13 = vand.u32 2147483647, %v2518_v55  ;;  %v3265_v53 = vand.u32 2147483647, %v2513_v31  ;;  %v789_v6 = vpop.permute.xlu0 %788 }
 0x1c7   : > { %1086 = vrot.lane.b32.xlu1 %v1079_v41, %s2094_s10  ;;  %v1077_v1 = vsel %vm640_vm3, %v1071_v38, %v1076_v40  ;;  %v923_v14 = vrot.slane %v909_v33, 2  ;;  %v919_v52 = vsel %vm640_vm3, %v917_v51, %v918_v47  ;;  %v1031_v20 = vrot.slane %v1018_v56, 2 }
 0x1c8   : > { %v1020_v11 = vmul.f32 0.41421357, %v3263_v16  ;;  %v1030_v18 = vrot.slane %v1016_v48, 2  ;;  %v1019_v62 = vmul.f32 0.41421357, %v3262_v13  ;;  %v795_v29 = vpop.permute.xlu1 %794  ;;  %v803_v59 = vsel %vm800_vm7, %v797_v30, %v799_v28 }
 0x1c9   : > { %v924_v58 = vsel %vm640_vm3, %v918_v47, %v923_v14  ;;  %v1017_v2 = vmul.f32 0.41421357, %v3265_v53  ;;  %v1015_v8 = vmul.f32 0.41421357, %v3266_v57  ;;  %v2590_v19 = vsub.f32 %v2459_v34, %v797_v30 }
 0x1ca   : > { %1084 = vrot.lane.b32.xlu0 %v1077_v1, %s2094_s10  ;;  %v1032_v60 = vsel %vm640_vm3, %v1030_v18, %v1031_v20  ;;  %v1035_v7 = vrot.slane %v1020_v11, 2  ;;  %v1033_v9 = vrot.slane %v1019_v62, 2  ;;  %v793_v35 = vpop.permute.xlu0 %792  ;;  %v801_v41 = vsel %vm800_vm7, %v789_v6, %v791_v63 }
 0x1cb   : > { %937 = vrot.lane.b32.xlu1 %v925_v44, %s2094_s10  ;;  %v1028_v21 = vrot.slane %v1017_v2, 2  ;;  %v1027_v23 = vrot.slane %v1015_v8, 2  ;;  %v2599_v33 = vsub.f32 %v2473_v32, %v789_v6  ;;  %v903_v42 = vmul.f32 %v2590_v19, %v2590_v19 }
 0x1cc   : > { %v1036_v22 = vsel %vm640_vm3, %v1031_v20, %v1035_v7  ;;  %v2604_v1 = vsub.f32 %v2467_v39, %v801_v41 }
 0x1cd   : > { %v1029_v26 = vsel %vm640_vm3, %v1027_v23, %v1028_v21  ;;  %v1034_v27 = vsel %vm640_vm3, %v1028_v21, %v1033_v9  ;;  %v899_v39 = vmul.f32 %v2599_v33, %v2599_v33 }
 0x1ce   : > { %935 = vrot.lane.b32.xlu0 %v923_v14, %s2094_s10  ;;  %v2615_v14 = vsub.f32 %v2484_v43, %v793_v35 }
 0x1cf   : > { %929 = vrot.lane.b32.xlu1 %v922_v15, %s2094_s10  ;;  %v900_v15 = vmul.f32 %v2604_v1, %v2604_v1 }
 0x1d2   : > { %927 = vrot.lane.b32.xlu0 %v919_v52, %s2094_s10 }
 0x1d3   : > { %933 = vrot.lane.b32.xlu1 %v926_v4, %s2094_s10 }
 0x1d6   : > { %931 = vrot.lane.b32.xlu0 %v924_v58, %s2094_s10 }
 0x1d7   : > { %1090 = vrot.lane.b32.xlu1 %v1078_v37, %s2094_s10 }
 0x1da   : > { %1088 = vrot.lane.b32.xlu0 %v1076_v40, %s2094_s10  ;;  %v2593_v40 = vsub.f32 %v2450_v54, %v803_v59  ;;  %v802_v54 = vsel %vm800_vm7, %v793_v35, %v795_v29  ;;  %v954_v29 = vand.u32 2147483647, %v2599_v33  ;;  %v955_v35 = vand.u32 2147483647, %v2604_v1 }
 0x1db   : > { %1039 = vrot.lane.b32.xlu1 %v1032_v60, %s2094_s10  ;;  %v2623_v47 = vsub.f32 %v2479_v17, %v802_v54  ;;  %v901_v17 = vmul.f32 %v2615_v14, %v2615_v14  ;;  %v3271_v59 = vand.u32 2147483647, %v2615_v14  ;;  %v3269_v54 = vand.u32 2147483647, %v2590_v19 }
 0x1dc   : > { %v904_v34 = vmul.f32 %v2593_v40, %v2593_v40 }
 0x1dd   : > { %v902_v20 = vmul.f32 %v2623_v47, %v2623_v47  ;;  %v3270_v41 = vand.u32 2147483647, %v2623_v47 }
 0x1de   : > { %1045 = vrot.lane.b32.xlu0 %v1033_v9, %s2094_s10 }
 0x1df   : > { %1043 = vrot.lane.b32.xlu1 %v1036_v22, %s2094_s10 }
 0x1e2   : > { %1037 = vrot.lane.b32.xlu0 %v1029_v26, %s2094_s10 }
 0x1e3   : > { %1047 = vrot.lane.b32.xlu1 %v1035_v7, %s2094_s10 }
 0x1e6   : > { %1041 = vrot.lane.b32.xlu0 %v1034_v27, %s2094_s10 }
 0x235   : > { %v2582_v36 = vpop.permute.xlu1 %1082 }
 0x238   : > { %v2584_v37 = vpop.permute.xlu0 %1080 }
 0x239   : > { %v2587_v38 = vpop.permute.xlu1 %1086 }
 0x23c   : > { %v2595_v24 = vpop.permute.xlu0 %1084 }
 0x23d   : > { %v938_v10 = vpop.permute.xlu1 %937 }
 0x240   : > { %v936_v44 = vpop.permute.xlu0 %935 }
 0x241   : > { %v941_v45 = vsel %vm800_vm7, %v936_v44, %v938_v10  ;;  %v2610_v46 = vadd.f32 %v936_v44, %v903_v42  ;;  %v930_v32 = vpop.permute.xlu1 %929  ;;  %v966_v10 = vmul.f32 0.41421357, %v954_v29  ;;  %v967_v42 = vmul.f32 0.41421357, %v955_v35 }
 0x242   : > { %v2612_v0 = vadd.f32 %v941_v45, %v904_v34  ;;  %v968_v34 = vmul.f32 0.41421357, %v3271_v59  ;;  %v969_v44 = vmul.f32 0.41421357, %v3270_v41 }
 0x243   : > { %v2620_v3 = vrot.slane %v2610_v46, 1  ;;  %v978_v45 = vrot.slane %v966_v10, 6 }
 0x244   : > { %3277 = vst [vmem:[#allocation14_spill] sm:$0xff] %v2612_v0  ;;  %v928_v51 = vpop.permute.xlu0 %927  ;;  %v2628_v52 = vrot.slane %v2612_v0, 1 }
 0x245   : > { %v939_v4 = vsel %vm800_vm7, %v928_v51, %v930_v32  ;;  %v2631_v43 = vadd.f32 %v928_v51, %v899_v39  ;;  %1279 = vrot.lane.b32.xlu0 %v2620_v3, %s2093_s9  ;;  %v934_v58 = vpop.permute.xlu1 %933  ;;  %v3268_v32 = vand.u32 2147483647, %v2593_v40  ;;  %v979_v39 = vrot.slane %v967_v42, 6 }
 0x246   : > { %v2635_v56 = vadd.f32 %v939_v4, %v900_v15  ;;  %1281 = vrot.lane.b32.xlu1 %v2628_v52, %s2093_s9  ;;  %v980_v15 = vrot.slane %v968_v34, 6  ;;  %v982_v51 = vrot.slane %v969_v44, 6  ;;  %v970_v4 = vmul.f32 0.41421357, %v3269_v54 }
 0x247   : > { %v2642_v48 = vrot.slane %v2631_v43, 7  ;;  %v1261_v26 = vrot.slane %v2631_v43, 1  ;;  %v1193_v44 = vrot.slane %v2610_v46, 6 }
 0x248   : > { %v932_v11 = vpop.permute.xlu0 %931  ;;  %v2647_v18 = vrot.slane %v2635_v56, 7  ;;  %v1264_v27 = vrot.slane %v2635_v56, 1 }
 0x249   : > { %v940_v62 = vsel %vm800_vm7, %v932_v11, %v934_v58  ;;  %v2650_v2 = vadd.f32 %v932_v11, %v901_v17  ;;  %1124 = vrot.lane.b32.xlu0 %v2642_v48, %s2095_s11  ;;  %v971_v17 = vmul.f32 0.41421357, %v3268_v32  ;;  %v981_v58 = vsel %vm876_vm6, %v978_v45, %v980_v15 }
 0x24a   : > { %v2654_v60 = vadd.f32 %v940_v62, %v902_v20  ;;  %1126 = vrot.lane.b32.xlu1 %v2647_v18, %s2095_s11  ;;  %v983_v20 = vsel %vm876_vm6, %v979_v39, %v982_v51  ;;  %v984_v11 = vrot.slane %v970_v4, 6 }
 0x24b   : > { %v2659_v7 = vrot.slane %v2650_v2, 7  ;;  %v1262_v22 = vrot.slane %v2650_v2, 1  ;;  %v986_v62 = vrot.slane %v971_v17, 6  ;;  %v1189_v10 = vrot.slane %v2650_v2, 6  ;;  %v1091_v17 = vpop.permute.xlu1 %1090 }
 0x24c   : > { %v2662_v8 = vrot.slane %v2654_v60, 7  ;;  %v1265_v23 = vrot.slane %v2654_v60, 1  ;;  %v1191_v34 = vrot.slane %v2654_v60, 6  ;;  %v1089_v4 = vpop.permute.xlu0 %1088 }
 0x24d   : > { %1132 = vrot.lane.b32.xlu0 %v2659_v7, %s2095_s11  ;;  %v2678_v9 = vsel %vm1117_vm8, %v2642_v48, %v2659_v7  ;;  %v2697_v28 = vsel %vm669_vm5, %v1261_v26, %v1262_v22  ;;  %v2708_v63 = vsel %vm669_vm5, %v1262_v22, %v2620_v3  ;;  %v985_v22 = vsel %vm876_vm6, %v980_v15, %v984_v11 }
 0x24e   : > { %1134 = vrot.lane.b32.xlu1 %v2662_v8, %s2095_s11  ;;  %v2684_v21 = vsel %vm1117_vm8, %v2647_v18, %v2662_v8  ;;  %v2702_v30 = vsel %vm669_vm5, %v1264_v27, %v1265_v23  ;;  %v2714_v6 = vsel %vm669_vm5, %v1265_v23, %v2628_v52  ;;  %v987_v23 = vsel %vm876_vm6, %v982_v51, %v986_v62 }
 0x24f   : > { %v1187_v26 = vrot.slane %v2631_v43, 6  ;;  %v1188_v27 = vrot.slane %v2635_v56, 6  ;;  %v1195_v15 = vrot.slane %v2612_v0, 6  ;;  %v1094_v57 = vsel %vm800_vm7, %v1089_v4, %v1091_v17 }
 0x250   : > { %v1105_v54 = vmul.f32 %v1089_v4, %v2590_v19 }
 0x251   : > { %1146 = vrot.lane.b32.xlu0 %v2642_v48, %s2093_s9  ;;  %v1190_v42 = vsel %vm876_vm6, %v1187_v26, %v1189_v10  ;;  %v1196_v51 = vsel %vm876_vm6, %v1191_v34, %v1195_v15  ;;  %v1101_v15 = vmul.f32 %v2584_v37, %v2599_v33 }
 0x252   : > { %1148 = vrot.lane.b32.xlu1 %v2647_v18, %s2093_s9  ;;  %vm1111_vm4 = vcmp.gt.f32.partialorder %v1105_v54, 0.0 }
 0x253   : > { %vm1107_vm11 = vcmp.gt.f32.partialorder %v1101_v15, 0.0 }
 0x255   : > { %1154 = vrot.lane.b32.xlu0 %v2659_v7, %s2093_s9 }
 0x256   : > { %1156 = vrot.lane.b32.xlu1 %v2662_v8, %s2093_s9 }
 0x259   : > { %1128 = vrot.lane.b32.xlu0 %v2678_v9, %s2095_s11 }
 0x25a   : > { %1130 = vrot.lane.b32.xlu1 %v2684_v21, %s2095_s11 }
 0x25d   : > { %1150 = vrot.lane.b32.xlu0 %v2678_v9, %s2093_s9 }
 0x25e   : > { %1152 = vrot.lane.b32.xlu1 %v2684_v21, %s2093_s9 }
 0x261   : > { %1271 = vrot.lane.b32.xlu0 %v2697_v28, %s2093_s9 }
 0x262   : > { %1273 = vrot.lane.b32.xlu1 %v2702_v30, %s2093_s9 }
 0x265   : > { %1275 = vrot.lane.b32.xlu0 %v2708_v63, %s2093_s9 }
 0x266   : > { %1277 = vrot.lane.b32.xlu1 %v2714_v6, %s2093_s9 }
 0x269   : > { %1292 = vrot.lane.b32.xlu0 %v2697_v28, %s2095_s11 }
 0x26a   : > { %1294 = vrot.lane.b32.xlu1 %v2702_v30, %s2095_s11 }
 0x26d   : > { %1296 = vrot.lane.b32.xlu0 %v2708_v63, %s2095_s11 }
 0x26e   : > { %1298 = vrot.lane.b32.xlu1 %v2714_v6, %s2095_s11 }
 0x271   : > { %1300 = vrot.lane.b32.xlu0 %v2620_v3, %s2095_s11 }
 0x272   : > { %1302 = vrot.lane.b32.xlu1 %v2628_v52, %s2095_s11 }
 0x275   : > { %988 = vrot.lane.b32.xlu0 %v978_v45, %s2091_s7  ;;  %v1194_v45 = vsel %vm876_vm6, %v1189_v10, %v1193_v44 }
 0x276   : > { %990 = vrot.lane.b32.xlu1 %v979_v39, %s2091_s7  ;;  %v1192_v39 = vsel %vm876_vm6, %v1188_v27, %v1191_v34  ;;  %v1092_v34 = vsel %vm800_vm7, %v2584_v37, %v2582_v36 }
 0x279   : > { %992 = vrot.lane.b32.xlu0 %v981_v58, %s2091_s7  ;;  %v2780_v58 = vpop.permute.xlu0 %1045 }
 0x27a   : > { %994 = vrot.lane.b32.xlu1 %v983_v20, %s2091_s7  ;;  %v1040_v20 = vpop.permute.xlu1 %1039 }
 0x27d   : > { %996 = vrot.lane.b32.xlu0 %v985_v22, %s2091_s7  ;;  %v1038_v11 = vpop.permute.xlu0 %1037 }
 0x27e   : > { %998 = vrot.lane.b32.xlu1 %v987_v23, %s2091_s7  ;;  %v1044_v62 = vpop.permute.xlu1 %1043  ;;  %vm2810_vm13 = vcmp.le.f32.partialorder %v954_v29, %v1038_v11 }
 0x281   : > { %1197 = vrot.lane.b32.xlu0 %v1187_v26, %s2093_s9  ;;  %v1042_v22 = vpop.permute.xlu0 %1041 }
 0x282   : > { %1199 = vrot.lane.b32.xlu1 %v1188_v27, %s2093_s9  ;;  %v2782_v23 = vpop.permute.xlu1 %1047  ;;  %v1050_v59 = vsel %vm800_vm7, %v1042_v22, %v1044_v62 }
 0x285   : > { %1201 = vrot.lane.b32.xlu0 %v1190_v42, %s2093_s9 }
 0x286   : > { %1333 = vrot.lane.b32.xlu1 %v1188_v27, %s2096_s18 }
 0x289   : > { %1205 = vrot.lane.b32.xlu0 %v1194_v45, %s2093_s9 }
 0x28a   : > { %1203 = vrot.lane.b32.xlu1 %v1192_v39, %s2093_s9 }
 0x28d   : > { %1331 = vrot.lane.b32.xlu0 %v1187_v26, %s2096_s18 }
 0x28e   : > { %1207 = vrot.lane.b32.xlu1 %v1196_v51, %s2093_s9 }
 0x291   : > { %1335 = vrot.lane.b32.xlu0 %v1190_v42, %s2096_s18 }
 0x292   : > { %1337 = vrot.lane.b32.xlu1 %v1192_v39, %s2096_s18  ;;  %v1102_v39 = vmul.f32 %v1092_v34, %v2604_v1 }
 0x294   : > { %vm1108_vm10 = vcmp.gt.f32.partialorder %v1102_v39, 0.0 }
 0x295   : > { %1339 = vrot.lane.b32.xlu0 %v1194_v45, %s2096_s18 }
 0x296   : > { %1341 = vrot.lane.b32.xlu1 %v1196_v51, %s2096_s18  ;;  %v1049_v51 = vsel %vm800_vm7, %v1038_v11, %v1040_v20 }
 0x297   : > { %vm2802_vm12 = vcmp.le.f32.partialorder %v955_v35, %v1049_v51 }
 0x2b7   : > { %v2784_v26 = vpop.permute.xlu0 %1279 }
 0x2b8   : > { %v2786_v27 = vpop.permute.xlu1 %1281 }
 0x2bb   : > { %v1125_v10 = vpop.permute.xlu0 %1124 }
 0x2bc   : > { %v1127_v42 = vpop.permute.xlu1 %1126 }
 0x2bd   : > { %v1137_v16 = vsel %vm1136_vm9, %v1125_v10, %v1127_v42 }
 0x2bf   : > { %v2791_v44 = vpop.permute.xlu0 %1132 }
 0x2c0   : > { %v2793_v45 = vpop.permute.xlu1 %1134 }
 0x2c1   : > { %v1139_v39 = vsel %vm1136_vm9, %v2791_v44, %v2793_v45 }
 0x2c3   : > { %v1147_v13 = vpop.permute.xlu0 %1146 }
 0x2c4   : > { %v1149_v50 = vpop.permute.xlu1 %1148 }
 0x2c5   : > { %v1158_v34 = vsel %vm3274_vm2, %v1147_v13, %v1149_v50  ;;  %v1168_v53 = vsel %vm1108_vm10, %v1137_v16, %v1149_v50 }
 0x2c6   : > { %v1167_v20 = vsel %vm1107_vm11, %v1125_v10, %v1158_v34  ;;  %v1180_v42 = vsel %vm2802_vm12, %v2647_v18, %v1168_v53  ;;  %v1093_v53 = vsel %vm800_vm7, %v2595_v24, %v2587_v38  ;;  %v1106_v38 = vmul.f32 %v1094_v57, %v2593_v40 }
 0x2c7   : > { %v1179_v35 = vsel %vm2810_vm13, %v2642_v48, %v1167_v20  ;;  %v2821_v51 = vrot.slane %v1180_v42, 6  ;;  %v1155_v13 = vpop.permute.xlu0 %1154  ;;  %v1103_v48 = vmul.f32 %v2595_v24, %v2615_v14  ;;  %v1104_v42 = vmul.f32 %v1093_v53, %v2623_v47 }
 0x2c8   : > { %v1224_v50 = vrot.slane %v1179_v35, 6  ;;  %v1157_v16 = vpop.permute.xlu1 %1156  ;;  %v3282_v53 = vand.u32 2147483647, %v2615_v14  ;;  %vm1112_vm8 = vcmp.gt.f32.partialorder %v1106_v38, 0.0 }
 0x2c9   : > { %1236 = vrot.lane.b32.xlu1 %v2821_v51, %s2091_s7  ;;  %vm1109_vm14 = vcmp.gt.f32.partialorder %v1103_v48, 0.0  ;;  %vm1110_vm15 = vcmp.gt.f32.partialorder %v1104_v42, 0.0  ;;  %v1285_v48 = vsel %vm3274_vm2, %v2784_v26, %v2786_v27 }
 0x2ca   : > { %1234 = vrot.lane.b32.xlu0 %v1224_v50, %s2091_s7  ;;  %vm2841_vm1 = vcmp.le.f32.partialorder %v3282_v53, %v1042_v22  ;;  %v3285_v22 = vand.u32 2147483647, %v2623_v47 }
 0x2cb   : > { %v1129_v29 = vpop.permute.xlu0 %1128 }
 0x2cc   : > { %v1131_v11 = vpop.permute.xlu1 %1130  ;;  %vm2854_vm5 = vcmp.le.f32.partialorder %v3285_v22, %v1050_v59  ;;  %v3288_v59 = vand.u32 2147483647, %v2590_v19 }
 0x2cd   : > { %v1138_v24 = vsel %vm1136_vm9, %v1129_v29, %v1131_v11 }
 0x2cf   : > { %v1151_v10 = vpop.permute.xlu0 %1150 }
 0x2d0   : > { %v1153_v34 = vpop.permute.xlu1 %1152 }
 0x2d1   : > { %v1159_v35 = vsel %vm3274_vm2, %v1151_v10, %v1153_v34  ;;  %v1170_v17 = vsel %vm1110_vm15, %v1138_v24, %v1153_v34 }
 0x2d2   : > { %v1169_v41 = vsel %vm1109_vm14, %v1129_v29, %v1159_v35  ;;  %v1160_v35 = vsel %vm3274_vm2, %v1155_v13, %v1157_v16 }
 0x2d3   : > { %v1272_v18 = vpop.permute.xlu0 %1271  ;;  %v1181_v57 = vsel %vm2841_vm1, %v2678_v9, %v1169_v41  ;;  %v1182_v9 = vsel %vm2854_vm5, %v2684_v21, %v1170_v17  ;;  %v1051_v21 = vsel %vm800_vm7, %v2780_v58, %v2782_v23  ;;  %v3291_v23 = vand.u32 2147483647, %v2593_v40 }
 0x2d4   : > { %v1274_v20 = vpop.permute.xlu1 %1273  ;;  %v1226_v37 = vrot.slane %v1181_v57, 6 }
 0x2d5   : > { %v1283_v0 = vsel %vm3274_vm2, %v1272_v18, %v1274_v20 }
 0x2d7   : > { %v1276_v49 = vpop.permute.xlu0 %1275 }
 0x2d8   : > { %v1278_v32 = vpop.permute.xlu1 %1277 }
 0x2db   : > { %v1293_v4 = vpop.permute.xlu0 %1292 }
 0x2dc   : > { %v1313_v62 = vsel %vm1107_vm11, %v1283_v0, %v1293_v4  ;;  %v1295_v29 = vpop.permute.xlu1 %1294  ;;  %vm2869_vm11 = vcmp.le.f32.partialorder %v3288_v59, %v2780_v58 }
 0x2dd   : > { %v1325_v34 = vsel %vm2810_vm13, %v2697_v28, %v1313_v62  ;;  %v1304_v13 = vsel %vm1136_vm9, %v1293_v4, %v1295_v29  ;;  %v1171_v28 = vsel %vm1111_vm4, %v2791_v44, %v1160_v35  ;;  %v1172_v4 = vsel %vm1112_vm8, %v1139_v39, %v1157_v16 }
 0x2de   : > { %v1359_v0 = vrot.slane %v1325_v34, 6  ;;  %v1314_v41 = vsel %vm1108_vm10, %v1274_v20, %v1304_v13  ;;  %v1284_v20 = vsel %vm3274_vm2, %v1276_v49, %v1278_v32  ;;  %v1228_v35 = vrot.slane %v1182_v9, 6 }
 0x2df   : > { %v1326_v18 = vsel %vm2802_vm12, %v2702_v30, %v1314_v41  ;;  %v1297_v24 = vpop.permute.xlu0 %1296  ;;  %v1183_v58 = vsel %vm2869_vm11, %v2659_v7, %v1171_v28  ;;  %vm2895_vm10 = vcmp.le.f32.partialorder %v3291_v23, %v1051_v21  ;;  %v1227_v16 = vsel %vm876_vm6, %v1224_v50, %v1226_v37 }
 0x2e0   : > { %v1360_v53 = vrot.slane %v1326_v18, 6  ;;  %v1299_v17 = vpop.permute.xlu1 %1298  ;;  %1369 = vrot.lane.b32.xlu0 %v1359_v0, %s2091_s7  ;;  %v1315_v30 = vsel %vm1109_vm14, %v1284_v20, %v1297_v24  ;;  %v1184_v7 = vsel %vm2895_vm10, %v2662_v8, %v1172_v4  ;;  %v1230_v42 = vrot.slane %v1183_v58, 6 }
 0x2e1   : > { %v1305_v36 = vsel %vm1136_vm9, %v1297_v24, %v1299_v17  ;;  %v1327_v57 = vsel %vm2841_vm1, %v2708_v63, %v1315_v30  ;;  %v1229_v29 = vsel %vm876_vm6, %v2821_v51, %v1228_v35  ;;  %v1232_v8 = vrot.slane %v1184_v7, 6 }
 0x2e2   : > { %1371 = vrot.lane.b32.xlu1 %v1360_v53, %s2091_s7  ;;  %v1316_v44 = vsel %vm1110_vm15, %v1278_v32, %v1305_v36  ;;  %v1361_v10 = vrot.slane %v1327_v57, 6  ;;  %v1231_v22 = vsel %vm876_vm6, %v1226_v37, %v1230_v42  ;;  %vm1343_vm1 = vcmask 1022976  }
 0x2e3   : > { %v1301_v45 = vpop.permute.xlu0 %1300  ;;  %v1328_v26 = vsel %vm2854_vm5, %v2714_v6, %v1316_v44  ;;  %v1233_v34 = vsel %vm876_vm6, %v1228_v35, %v1232_v8  ;;  %v3300_v8 = vand.u32 2147483647, %v2513_v31 }
 0x2e4   : > { %v1303_v62 = vpop.permute.xlu1 %1302  ;;  %1238 = vrot.lane.b32.xlu0 %v1227_v16, %s2091_s7  ;;  %v1317_v32 = vsel %vm1111_vm4, %v1285_v48, %v1301_v45  ;;  %v1363_v51 = vrot.slane %v1328_v26, 6 }
 0x2e5   : > { %v1306_v50 = vsel %vm1136_vm9, %v1301_v45, %v1303_v62  ;;  %v1329_v54 = vsel %vm2869_vm11, %v2620_v3, %v1317_v32  ;;  %v3294_v62 = vand.u32 2147483647, %v2498_v61  ;;  %vm1488_vm11 = vcmp.gt.f32.partialorder %v2631_v43, 0.01 }
 0x2e6   : > { %1240 = vrot.lane.b32.xlu1 %v1229_v29, %s2091_s7  ;;  %v1318_v63 = vsel %vm1112_vm8, %v2786_v27, %v1306_v50  ;;  %v1365_v11 = vrot.slane %v1329_v54, 6  ;;  %v1362_v27 = vsel %vm876_vm6, %v1359_v0, %v1361_v10  ;;  %v1364_v13 = vsel %vm876_vm6, %v1360_v53, %v1363_v51 }
 0x2e7   : > { %v1330_v6 = vsel %vm2895_vm10, %v2628_v52, %v1318_v63  ;;  %v989_v52 = vpop.permute.xlu0 %988  ;;  %v3297_v29 = vand.u32 2147483647, %v2505_v5  ;;  %v3303_v63 = vand.u32 2147483647, %v2503_v25  ;;  %v3306_v54 = vand.u32 2147483647, %v2510_v12 }
 0x2e8   : > { %1242 = vrot.lane.b32.xlu0 %v1231_v22, %s2091_s7  ;;  %v1367_v38 = vrot.slane %v1330_v6, 6  ;;  %v1366_v3 = vsel %vm876_vm6, %v1361_v10, %v1365_v11  ;;  %v991_v41 = vpop.permute.xlu1 %990 }
 0x2e9   : > { %v1000_v16 = vsel %vm336_vm0, %v989_v52, %v991_v41 }
 0x2ea   : > { %1244 = vrot.lane.b32.xlu1 %v1233_v34, %s2091_s7  ;;  %v1368_v9 = vsel %vm876_vm6, %v1363_v51, %v1367_v38  ;;  %vm2948_vm6 = vcmp.le.f32.partialorder %v3294_v62, %v991_v41  ;;  %vm2955_vm9 = vcmp.le.f32.partialorder %v3297_v29, %v1000_v16  ;;  %v3309_v34 = vand.u32 2147483647, %v2518_v55 }
 0x2eb   : > { %v993_v59 = vpop.permute.xlu0 %992 }
 0x2ec   : > { %1373 = vrot.lane.b32.xlu0 %v1362_v27, %s2091_s7  ;;  %v995_v15 = vpop.permute.xlu1 %994 }
 0x2ed   : > { %v1001_v48 = vsel %vm336_vm0, %v993_v59, %v995_v15  ;;  %vm2967_vm13 = vcmp.le.f32.partialorder %v3303_v63, %v995_v15 }
 0x2ee   : > { %1375 = vrot.lane.b32.xlu1 %v1364_v13, %s2091_s7  ;;  %vm2961_vm12 = vcmp.le.f32.partialorder %v3300_v8, %v1001_v48 }
 0x2ef   : > { %v997_v0 = vpop.permute.xlu0 %996 }
 0x2f0   : > { %1377 = vrot.lane.b32.xlu0 %v1366_v3, %s2091_s7  ;;  %v999_v28 = vpop.permute.xlu1 %998 }
 0x2f1   : > { %v1002_v57 = vsel %vm336_vm0, %v997_v0, %v999_v28  ;;  %vm2973_vm14 = vcmp.le.f32.partialorder %v3306_v54, %v999_v28 }
 0x2f2   : > { %1379 = vrot.lane.b32.xlu1 %v1368_v9, %s2091_s7  ;;  %vm2979_vm15 = vcmp.le.f32.partialorder %v3309_v34, %v1002_v57  ;;  %s2098_s7 = smov [#allocation6]  }
 0x2f3   : > { %v1198_v37 = vpop.permute.xlu0 %1197  ;;  %s1969_s8 = sshll.u32 %s2098_s7, 4  ;;  %s1970_s8 = int_to_ptr.vmem [resolvable:$false] %s1969_s8 }
 0x2f4   : > { %v1200_v18 = vpop.permute.xlu1 %1199  ;;  %p1972_p12 = scmp.lt.s32.totalorder %s3125_s28, %s1970_s8 }
 0x2f5   : > { %v1209_v59 = vsel %vm3274_vm2, %v1198_v37, %v1200_v18 }
 0x2f7   : > { %v1202_v24 = vpop.permute.xlu0 %1201 }
 0x2f8   : > { %v2939_v21 = vpop.permute.xlu1 %1333 }
 0x2fb   : > { %v1206_v39 = vpop.permute.xlu0 %1205 }
 0x2fc   : > { %v1204_v20 = vpop.permute.xlu1 %1203 }
 0x2fd   : > { %v1210_v11 = vsel %vm3274_vm2, %v1202_v24, %v1204_v20 }
 0x2ff   : > { %v1332_v53 = vpop.permute.xlu0 %1331 }
 0x300   : > { %v1208_v17 = vpop.permute.xlu1 %1207  ;;  %v1344_v8 = vsel %vm1343_vm1, %v1332_v53, %v2939_v21 }
 0x301   : > { %v1211_v3 = vsel %vm3274_vm2, %v1206_v39, %v1208_v17 }
 0x303   : > { %v1336_v4 = vpop.permute.xlu0 %1335 }
 0x304   : > { %v1338_v35 = vpop.permute.xlu1 %1337 }
 0x305   : > { %v1345_v48 = vsel %vm1343_vm1, %v1336_v4, %v1338_v35 }
 0x307   : > { %v1340_v30 = vpop.permute.xlu0 %1339 }
 0x308   : > { %v2941_v36 = vpop.permute.xlu1 %1341 }
 0x309   : > { %v1346_v10 = vsel %vm1343_vm1, %v1340_v30, %v2941_v36 }
 0x33b   : > { %v1237_v23 = vpop.permute.xlu1 %1236 }
 0x33c   : > { %v1235_v58 = vpop.permute.xlu0 %1234  ;;  %v1256_v15 = vsel %vm2948_vm6, %v1200_v18, %v1237_v23 }
 0x33d   : > { %v1246_v27 = vsel %vm336_vm0, %v1235_v58, %v1237_v23 }
 0x33e   : > { %v1255_v24 = vsel %vm2955_vm9, %v1209_v59, %v1246_v27  ;;  %v1501_v27 = vadd.f32 1e-24, %v2635_v56 }
 0x33f   : > { %v1402_v37 = vrot.slane %v1255_v24, 2 }
 0x340   : > { %1953 = vrsqrt.f32 %v1501_v27 }
 0x352   : > { %v1370_v49 = vpop.permute.xlu0 %1369 }
 0x354   : > { %v1372_v44 = vpop.permute.xlu1 %1371 }
 0x355   : > { %v1391_v4 = vsel %vm2948_vm6, %v2939_v21, %v1372_v44  ;;  %vm1489_vm6 = vcmp.gt.f32.partialorder %v2635_v56, 0.01 }
 0x356   : > { %v1239_v45 = vpop.permute.xlu0 %1238 }
 0x358   : > { %v1241_v7 = vpop.permute.xlu1 %1240 }
 0x359   : > { %v1247_v32 = vsel %vm336_vm0, %v1239_v45, %v1241_v7  ;;  %v1258_v38 = vsel %vm2967_vm13, %v1204_v20, %v1241_v7  ;;  %v1381_v7 = vsel %vm336_vm0, %v1370_v49, %v1372_v44  ;;  %v1448_v44 = vrot.slane %v1391_v4, 2 }
 0x35a   : > { %v1243_v50 = vpop.permute.xlu0 %1242  ;;  %v1257_v9 = vsel %vm2961_vm12, %v1210_v11, %v1247_v32  ;;  %v1406_v39 = vrot.slane %v1258_v38, 2  ;;  %v1390_v49 = vsel %vm2955_vm9, %v1344_v8, %v1381_v7  ;;  %v1500_v38 = vadd.f32 1e-24, %v2631_v43 }
 0x35b   : > { %v1403_v45 = vrot.slane %v1257_v9, 2  ;;  %v1445_v26 = vrot.slane %v1390_v49, 2  ;;  %v1502_v7 = vadd.f32 1e-24, %v2650_v2 }
 0x35c   : > { %v1245_v13 = vpop.permute.xlu1 %1244  ;;  %1955 = vrsqrt.f32 %v1500_v38 }
 0x35d   : > { %v1248_v52 = vsel %vm336_vm0, %v1243_v50, %v1245_v13  ;;  %v1260_v41 = vsel %vm2973_vm14, %v1208_v17, %v1245_v13  ;;  %v1405_v17 = vrot.slane %v1256_v15, 2  ;;  %v1404_v32 = vsel %vm640_vm3, %v1402_v37, %v1403_v45 }
 0x35e   : > { %v1259_v0 = vsel %vm2979_vm15, %v1211_v3, %v1248_v52  ;;  %v1410_v28 = vrot.slane %v1260_v41, 2  ;;  %v1374_v58 = vpop.permute.xlu0 %1373  ;;  %1957 = vrsqrt.f32 %v1502_v7 }
 0x35f   : > { %v1408_v20 = vrot.slane %v1259_v0, 2  ;;  %v1407_v23 = vsel %vm640_vm3, %v1405_v17, %v1406_v39 }
 0x360   : > { %v1376_v16 = vpop.permute.xlu1 %1375  ;;  %1422 = vrot.lane.b32.xlu1 %v1410_v28, %s2094_s10  ;;  %v1411_v22 = vsel %vm640_vm3, %v1406_v39, %v1410_v28  ;;  %v3314_v28 = vld [vmem:[#allocation14_spill] sm:$0xff] }
 0x361   : > { %1420 = vrot.lane.b32.xlu0 %v1408_v20, %s2094_s10  ;;  %v1382_v18 = vsel %vm336_vm0, %v1374_v58, %v1376_v16  ;;  %v1393_v57 = vsel %vm2967_vm13, %v1338_v35, %v1376_v16  ;;  %v1409_v21 = vsel %vm640_vm3, %v1403_v45, %v1408_v20  ;;  %v2097_v58 = vmov 0  }
 0x362   : > { %v1392_v50 = vsel %vm2961_vm12, %v1345_v48, %v1382_v18  ;;  %v1378_v29 = vpop.permute.xlu0 %1377  ;;  %v1449_v63 = vrot.slane %v1393_v57, 2 }
 0x363   : > { %v1446_v54 = vrot.slane %v1392_v50, 2 }
 0x364   : > { %1414 = vrot.lane.b32.xlu1 %v1407_v23, %s2094_s10  ;;  %v1380_v62 = vpop.permute.xlu1 %1379  ;;  %v1450_v11 = vsel %vm640_vm3, %v1448_v44, %v1449_v63 }
 0x365   : > { %1412 = vrot.lane.b32.xlu0 %v1404_v32, %s2094_s10  ;;  %v1383_v35 = vsel %vm336_vm0, %v1378_v29, %v1380_v62  ;;  %v1395_v53 = vsel %vm2973_vm14, %v2941_v36, %v1380_v62  ;;  %v1447_v51 = vsel %vm640_vm3, %v1445_v26, %v1446_v54  ;;  %v1505_v26 = vadd.f32 1e-24, %v3314_v28 }
 0x366   : > { %v1394_v42 = vsel %vm2979_vm15, %v1346_v10, %v1383_v35  ;;  %v1453_v34 = vrot.slane %v1395_v53, 2  ;;  %v1503_v35 = vadd.f32 1e-24, %v2654_v60 }
 0x367   : > { %v1451_v30 = vrot.slane %v1394_v42, 2 }
 0x368   : > { %1418 = vrot.lane.b32.xlu1 %v1411_v22, %s2094_s10  ;;  %v1454_v36 = vsel %vm640_vm3, %v1449_v63, %v1453_v34  ;;  %1959 = vrsqrt.f32 %v1503_v35 }
 0x369   : > { %1416 = vrot.lane.b32.xlu0 %v1409_v21, %s2094_s10  ;;  %v1452_v6 = vsel %vm640_vm3, %v1446_v54, %v1451_v30 }
 0x36c   : > { %1457 = vrot.lane.b32.xlu1 %v1450_v11, %s2094_s10 }
 0x36d   : > { %1455 = vrot.lane.b32.xlu0 %v1447_v51, %s2094_s10 }
 0x370   : > { %1461 = vrot.lane.b32.xlu1 %v1454_v36, %s2094_s10 }
 0x371   : > { %1459 = vrot.lane.b32.xlu0 %v1452_v6, %s2094_s10 }
 0x374   : > { %1465 = vrot.lane.b32.xlu1 %v1453_v34, %s2094_s10 }
 0x375   : > { %1463 = vrot.lane.b32.xlu0 %v1451_v30, %s2094_s10 }
 0x378   : > { %1571 = vrot.lane.b32.xlu1 %v2604_v1, %s2096_s18 }
 0x379   : > { %1569 = vrot.lane.b32.xlu0 %v2599_v33, %s2096_s18 }
 0x37c   : > { %1575 = vrot.lane.b32.xlu1 %v2623_v47, %s2096_s18 }
 0x37d   : > { %1573 = vrot.lane.b32.xlu0 %v2615_v14, %s2096_s18 }
 0x380   : > { %1579 = vrot.lane.b32.xlu1 %v2593_v40, %s2096_s18 }
 0x381   : > { %1577 = vrot.lane.b32.xlu0 %v2590_v19, %s2096_s18  ;;  %v1954_v19 = vpop.eup %1953 }
 0x382   : > { %v1956_v40 = vpop.eup %1955 }
 0x384   : > { %1592 = vrot.lane.b32.xlu1 %v2498_v61, %s2093_s9 }
 0x385   : > { %1590 = vrot.lane.b32.xlu0 %v2505_v5, %s2093_s9 }
 0x388   : > { %1596 = vrot.lane.b32.xlu1 %v2503_v25, %s2093_s9 }
 0x389   : > { %1594 = vrot.lane.b32.xlu0 %v2513_v31, %s2093_s9 }
 0x38c   : > { %1600 = vrot.lane.b32.xlu1 %v2510_v12, %s2093_s9 }
 0x38d   : > { %1598 = vrot.lane.b32.xlu0 %v2518_v55, %s2093_s9  ;;  %s1971_s9 = scalar_lea.vmem %s1970_s8, 1024 }
 0x38e   : > { %p1973_p13 = scmp.lt.s32.totalorder %s1971_s9, %s1965_s30 }
 0x390   : > { %1620 = vrot.lane.b32.xlu1 %v1954_v19, %s2096_s18  ;;  %p1974_p0 = por %p1973_p13, %p1972_p12 }
 0x391   : > { %1618 = vrot.lane.b32.xlu0 %v1956_v40, %s2096_s18 }
 0x392   : > { %p1975_p1 = pnand %p1974_p0, %p1968_p11 }
 0x3d2   : > { %v1423_v61 = vpop.permute.xlu1 %1422 }
 0x3d3   : > { %v1421_v5 = vpop.permute.xlu0 %1420 }
 0x3d4   : > { %v1426_v15 = vsel %vm800_vm7, %v1421_v5, %v1423_v61 }
 0x3d6   : > { %v1415_v33 = vpop.permute.xlu1 %1414 }
 0x3d7   : > { %v1413_v1 = vpop.permute.xlu0 %1412 }
 0x3d8   : > { %v1424_v31 = vsel %vm800_vm7, %v1413_v1, %v1415_v33  ;;  %vm1433_vm0 = vcmp.ge.f32.partialorder %v2631_v43, %v1413_v1  ;;  %v1958_v33 = vpop.eup %1957 }
 0x3d9   : > { %vm1434_vm4 = vcmp.ge.f32.partialorder %v2635_v56, %v1424_v31 }
 0x3da   : > { %v1419_v25 = vpop.permute.xlu1 %1418 }
 0x3db   : > { %v1417_v14 = vpop.permute.xlu0 %1416 }
 0x3dc   : > { %v1425_v9 = vsel %vm800_vm7, %v1417_v14, %v1419_v25 }
 0x3de   : > { %v1458_v47 = vpop.permute.xlu1 %1457 }
 0x3df   : > { %v1456_v13 = vpop.permute.xlu0 %1455 }
 0x3e0   : > { %v1467_v12 = vsel %vm800_vm7, %v1456_v13, %v1458_v47  ;;  %vm1476_vm3 = vcmp.ge.f32.partialorder %v2631_v43, %v1456_v13 }
 0x3e1   : > { %vm1477_vm5 = vcmp.ge.f32.partialorder %v2635_v56, %v1467_v12  ;;  %vm1482_vm8 = vmand %vm1433_vm0, %vm1476_vm3  ;;  %vm1435_vm0 = vcmp.ge.f32.partialorder %v2650_v2, %v1417_v14 }
 0x3e2   : > { %vm1483_vm10 = vmand %vm1434_vm4, %vm1477_vm5  ;;  %v1462_v55 = vpop.permute.xlu1 %1461  ;;  %vm1436_vm4 = vcmp.ge.f32.partialorder %v2654_v60, %v1425_v9 }
 0x3e3   : > { %vm1494_vm9 = vmand %vm1482_vm8, %vm1488_vm11  ;;  %v1460_v3 = vpop.permute.xlu0 %1459  ;;  %vm1490_vm8 = vcmp.gt.f32.partialorder %v2650_v2, 0.01 }
 0x3e4   : > { %vm1495_vm12 = vmand %vm1483_vm10, %vm1489_vm6  ;;  %v1468_v52 = vsel %vm800_vm7, %v1460_v3, %v1462_v55  ;;  %vm1478_vm13 = vcmp.ge.f32.partialorder %v2650_v2, %v1460_v3  ;;  %vm1491_vm10 = vcmp.gt.f32.partialorder %v2654_v60, 0.01  ;;  %v1504_v2 = vadd.f32 1e-24, %v2610_v46 }
 0x3e5   : > { %vm1512_vm14 = vmpackc.low %vm1495_vm12, %vm1494_vm9  ;;  %vm1479_vm15 = vcmp.ge.f32.partialorder %v2654_v60, %v1468_v52 }
 0x3e6   : > { %vm3083_vm3 = vmpackc.even %vm1512_vm14, %vm1512_vm14  ;;  %v1466_v41 = vpop.permute.xlu1 %1465  ;;  %1961 = vrsqrt.f32 %v1504_v2 }
 0x3e7   : > { %vm1484_vm5 = vmand %vm1435_vm0, %vm1478_vm13  ;;  %v1464_v56 = vpop.permute.xlu0 %1463  ;;  %vm1437_vm13 = vcmp.ge.f32.partialorder %v2610_v46, %v1421_v5  ;;  %v1518_v17 = vsel %vm3083_vm3, 16843009, %v2097_v58  ;;  %vm3315_vm3 = vcmask 1039360   ;;  %1963 = vrsqrt.f32 %v1505_v26 }
 0x3e8   : > { %vm1485_vm11 = vmand %vm1436_vm4, %vm1479_vm15  ;;  %v1469_v59 = vsel %vm800_vm7, %v1464_v56, %v1466_v41  ;;  %vm1480_vm12 = vcmp.ge.f32.partialorder %v2610_v46, %v1464_v56  ;;  %vm1438_vm15 = vcmp.ge.f32.partialorder %v3314_v28, %v1426_v15  ;;  %vm1492_vm7 = vcmp.gt.f32.partialorder %v2610_v46, 0.01 }
 0x3e9   : > { %vm1496_vm6 = vmand %vm1484_vm5, %vm1490_vm8  ;;  %vm1481_vm2 = vcmp.ge.f32.partialorder %v3314_v28, %v1469_v59  ;;  %vm1493_vm8 = vcmp.gt.f32.partialorder %v3314_v28, 0.01  ;;  %v1521_v57 = vunpack.c.0.s8 %v1518_v17  ;;  %v1522_v50 = vunpack.c.1.s8 %v1518_v17 }
 0x3ea   : > { %vm1497_vm9 = vmand %vm1485_vm11, %vm1491_vm10  ;;  %v1572_v0 = vpop.permute.xlu1 %1571 }
 0x3eb   : > { %vm1514_vm14 = vmpackc.low %vm1497_vm9, %vm1496_vm6  ;;  %v1570_v24 = vpop.permute.xlu0 %1569 }
 0x3ec   : > { %vm1515_vm0 = vmpackc.even %vm1514_vm14, %vm1514_vm14  ;;  %v1581_v39 = vsel %vm1343_vm1, %v1570_v24, %v1572_v0 }
 0x3ed   : > { %vm1486_vm4 = vmand %vm1437_vm13, %vm1480_vm12  ;;  %1587 = vst [vmem:[%s2192_s5 - $0x1] sm:$0xfe] %v1581_v39  ;;  %v1519_v45 = vsel %vm1515_vm0, 16843009, %v2097_v58 }
 0x3ee   : > { %vm1487_vm5 = vmand %vm1438_vm15, %vm1481_vm2  ;;  %v1576_v20 = vpop.permute.xlu1 %1575  ;;  %v1523_v18 = vunpack.c.0.s8 %v1519_v45  ;;  %v1524_v23 = vunpack.c.1.s8 %v1519_v45 }
 0x3ef   : > { %vm1498_vm11 = vmand %vm1486_vm4, %vm1492_vm7  ;;  %v1574_v16 = vpop.permute.xlu0 %1573 }
 0x3f0   : > { %vm1499_vm10 = vmand %vm1487_vm5, %vm1493_vm8  ;;  %v1582_v37 = vsel %vm1343_vm1, %v1574_v16, %v1576_v20  ;;  %v1527_v49 = vpack.c.b16 %v1523_v18, %v1521_v57  ;;  %v1530_v63 = vpack.c.b16 %v1524_v23, %v1522_v50 }
 0x3f1   : > { %vm1516_vm6 = vmpackc.low %vm1499_vm10, %vm1498_vm11  ;;  %1588 = vst [vmem:[%s2192_s5 + $0x7] sm:$0xff] %v1582_v37 }
 0x3f2   : > { %vm1517_vm2 = vmpackc.even %vm1516_vm6, %vm1516_vm6  ;;  %v1580_v48 = vpop.permute.xlu1 %1579 }
 0x3f3   : > { %v1520_v62 = vsel %vm1517_vm2, 16843009, %v2097_v58  ;;  %v1578_v32 = vpop.permute.xlu0 %1577  ;;  %vm3316_vm9 = vmmov %vm3315_vm3 }
 0x3f4   : > { %v1525_v29 = vunpack.c.0.s8 %v1520_v62  ;;  %v1526_v8 = vunpack.c.1.s8 %v1520_v62  ;;  %v1583_v4 = vsel %vm1343_vm1, %v1578_v32, %v1580_v48  ;;  %vm3317_vm12 = vmmov %vm3315_vm3 }
 0x3f5   : > { %1589 = vst [vmem:[%s2192_s5 + $0xf] sm:$0x1] %v1583_v4 }
 0x3f6   : > { %v1528_v22 = vpack.c.b16 %v1525_v29, %v1525_v29  ;;  %v1531_v10 = vpack.c.b16 %v1526_v8, %v1526_v8  ;;  %v1593_v54 = vpop.permute.xlu1 %1592 }
 0x3f7   : > { %v1591_v53 = vpop.permute.xlu0 %1590 }
 0x3f8   : > { %v1529_v21 = vpack.c.b8 %v1528_v22, %v1527_v49  ;;  %v1532_v44 = vpack.c.b8 %v1531_v10, %v1530_v63  ;;  %v1602_v42 = vsel %vm3315_vm3, %v1591_v53, %v1593_v54 }
 0x3f9   : > { %1872 = vst [vmem:[%s2192_s5 + $0xd] sm:$0xf8] %v1602_v42 }
 0x3fa   : > { %v1597_v60 = vpop.permute.xlu1 %1596  ;;  %v1543_v34 = vshll.u32 %v1532_v44, 24  ;;  %v1536_v11 = vshll.u32 %v1529_v21, 24  ;;  %v1541_v30 = vshrl.u32 %v1532_v44, 8  ;;  %v1534_v36 = vshrl.u32 %v1529_v21, 8 }
 0x3fb   : > { %v1595_v46 = vpop.permute.xlu0 %1594 }
 0x3fc   : > { %v1545_v51 = vrot.slane %v1543_v34, 1  ;;  %v1538_v6 = vrot.slane %v1536_v11, 1  ;;  %v1603_v27 = vsel %vm3316_vm9, %v1595_v46, %v1597_v60 }
 0x3fd   : > { %1873 = vst [vmem:[%s2192_s5 + $0x15] sm:$0xff] %v1603_v27 }
 0x3fe   : > { %v1546_v38 = vor.u32 %v1545_v51, %v1541_v30  ;;  %v1539_v19 = vor.u32 %v1538_v6, %v1534_v36  ;;  %v1601_v40 = vpop.permute.xlu1 %1600 }
 0x3ff   : > { %v1599_v61 = vpop.permute.xlu0 %1598 }
 0x400   : > { %1549 = vrot.lane.b32.xlu1 %v1546_v38, %s2096_s18  ;;  %1547 = vrot.lane.b32.xlu0 %v1539_v19, %s2096_s18  ;;  %v1604_v5 = vsel %vm3317_vm12, %v1599_v61, %v1601_v40 }
 0x401   : > { %1874 = vst [vmem:[%s2192_s5 + $0x1d] sm:$0x7] %v1604_v5 }
 0x402   : > { %v1621_v1 = vpop.permute.xlu1 %1620 }
 0x403   : > { %1978 = shalt.err (!%p1975_p1)
}
 0x404   : > { %s1979_s5 = scalar_lea.hbm %s3122_s27, 512  ;;  %s1983_s24 = scalar_lea.hbm %s3260_s2, 1024 }
 0x405   : > { %p1980_p2 = scmp.ne.s32.totalorder %s3122_s27, %s1979_s5  ;;  %p1984_p5 = scmp.lt.u32.totalorder %s3122_s27, %s3260_s2 }
 0x406   : > { %p1985_p8 = scmp.lt.u32.totalorder %s1983_s24, %s1979_s5  ;;  %p1987_p10 = scmp.lt.u32.totalorder %s1979_s5, %s3122_s27 }
 0x407   : > { %p1981_p3 = pnand %p1980_p2, %p2163_p7 }
 0x408   : > { %p1986_p9 = por %p1985_p8, %p1984_p5 }
 0x409   : > { %p1982_p4 = pneg %p1981_p3 }
 0x40a   : > { %p1988_p11 = por %p1987_p10, %p1986_p9 }
 0x40c   : > { %p1989_p12 = pnand %p1988_p11, %p1982_p4 }
 0x40e   : > { %1992 = shalt.err (!%p1989_p12)
}
 0x40f   : > { %s2099_s30 = smov 128   ;;  %s2100_s7 = smov 8   ;;  %v1960_v25 = vpop.eup %1959  ;;  %v1619_v14 = vpop.permute.xlu0 %1618  ;;  %1622 = vrot.lane.b32.xlu0 %v1958_v33, %s2096_s18 }
 0x410   : > { %1895 = dma.vmem_to_hbm [thread:$0]  (%p2163_p7), %s3125_s28, 512, %s3122_s27, %s3131_s29, %s2099_s30, %s2099_s30, %s2100_s7   ;;  %v1630_v31 = vsel %vm1343_vm1, %v1619_v14, %v1621_v1  ;;  %v1962_v47 = vpop.eup %1961 }
 0x411   : > { %1624 = vrot.lane.b32.xlu1 %v1960_v25, %s2096_s18  ;;  %1636 = vst [vmem:[%s2194_s6 - $0x1] sm:$0xfe] %v1630_v31  ;;  %v1964_v13 = vpop.eup %1963  ;;  %s1891_s27 = sshll.u32 %s2085_s14, 6  ;;  %s1665_s28 = sshll.u32 %s2190_s4, 4  ;;  %s3177_s28 = int_to_ptr.vmem [resolvable:$true] %s1665_s28 }
 0x412   : > { %s1701_s8 = sshll.u32 %s2194_s6, 4  ;;  %s3175_s11 = scalar_lea.hbm %s3259_s1, %s1891_s27  ;;  %s3185_s8 = int_to_ptr.vmem [resolvable:$true] %s1701_s8 }
 0x413   : > { %1626 = vrot.lane.b32.xlu0 %v1962_v47, %s2096_s18  ;;  %s1640_s25 = scalar_lea.sflag [#allocation5], %s2169_s23  ;;  %s1993_s26 = scalar_lea.vmem %s3177_s28, 64 }
 0x414   : > { %p1994_p13 = scmp.ne.s32.totalorder %s3177_s28, %s1993_s26  ;;  %s2101_s27 = smov [#allocation4]  }
 0x415   : > { %1628 = vrot.lane.b32.xlu1 %v1964_v13, %s2096_s18  ;;  %s1893_s18 = sshll.u32 %s2085_s14, 8  ;;  %s1997_s9 = sshll.u32 %s2101_s27, 4  ;;  %s1998_s9 = int_to_ptr.vmem [resolvable:$false] %s1997_s9 }
 0x416   : > { %s3183_s24 = scalar_lea.hbm %s3261_s3, %s1893_s18  ;;  %p1995_p0 = pnand %p1994_p13, %p2163_p7 }
 0x417   : > { %s1999_s5 = scalar_lea.vmem %s1998_s9, 128  ;;  %p2000_p2 = scmp.lt.s32.totalorder %s3177_s28, %s1998_s9 }
 0x418   : > { %p1996_p1 = pneg %p1995_p0  ;;  %p2001_p3 = scmp.lt.s32.totalorder %s1999_s5, %s1993_s26 }
 0x41a   : > { %p2002_p4 = por %p2001_p3, %p2000_p2 }
 0x41c   : > { %p2003_p5 = pnand %p2002_p4, %p1996_p1 }
 0x472   : > { %v1550_v12 = vpop.permute.xlu1 %1549  ;;  %v1548_v55 = vpop.permute.xlu0 %1547 }
 0x473   : > { %v1552_v3 = vsel %vm1343_vm1, %v1548_v55, %v1550_v12 }
 0x474   : > { %vm1553_vm14 = vnez %v1552_v3 }
 0x475   : > { %v1554_v9 = vsel %vm1553_vm14, 16843009, %v2097_v58 }
 0x476   : > { %v1555_v52 = vunpack.c.0.s8 %v1554_v9  ;;  %v1556_v43 = vunpack.c.1.s8 %v1554_v9 }
 0x478   : > { %v1557_v15 = vpack.c.b16 %v1555_v52, %v1555_v52  ;;  %v1559_v0 = vpack.c.b16 %v1556_v43, %v1556_v43 }
 0x47a   : > { %v1558_v28 = vpack.c.b8 %v1557_v15, %v1557_v15  ;;  %v1560_v24 = vpack.c.b8 %v1559_v0, %v1559_v0 }
 0x47c   : > { %1561 = vst [vmem:[%s2190_s4] sm:$0x3] %v1558_v28  ;;  %1562 = vst [vmem:[%s2190_s4 + $0x2] sm:$0x3] %v1560_v24 }
 0x481   : > { %v1623_v56 = vpop.permute.xlu0 %1622 }
 0x483   : > { %v1625_v41 = vpop.permute.xlu1 %1624 }
 0x484   : > { %v1631_v59 = vsel %vm1343_vm1, %v1623_v56, %v1625_v41 }
 0x485   : > { %1637 = vst [vmem:[%s2194_s6 + $0x7] sm:$0xff] %v1631_v59  ;;  %v1627_v20 = vpop.permute.xlu0 %1626 }
 0x487   : > { %v1629_v39 = vpop.permute.xlu1 %1628 }
 0x488   : > { %v1632_v58 = vsel %vm1343_vm1, %v1627_v20, %v1629_v39 }
 0x489   : > { %1638 = vst [vmem:[%s2194_s6 + $0xf] sm:$0x1] %v1632_v58 }
 0x48a   : > { %2006 = shalt.err (!%p2003_p5)
}
 0x48b   : > { %s2007_s4 = scalar_lea.hbm %s3175_s11, 64  ;;  %s2011_s19 = scalar_lea.hbm %s3259_s1, 128 }
 0x48c   : > { %p2008_p8 = scmp.ne.s32.totalorder %s3175_s11, %s2007_s4  ;;  %p2012_p11 = scmp.lt.u32.totalorder %s3175_s11, %s3259_s1 }
 0x48d   : > { %p2013_p12 = scmp.lt.u32.totalorder %s2011_s19, %s2007_s4  ;;  %p2015_p0 = scmp.lt.u32.totalorder %s2007_s4, %s3175_s11 }
 0x48e   : > { %p2009_p9 = pnand %p2008_p8, %p2163_p7 }
 0x48f   : > { %p2014_p13 = por %p2013_p12, %p2012_p11 }
 0x490   : > { %p2010_p10 = pneg %p2009_p9 }
 0x491   : > { %p2016_p1 = por %p2015_p0, %p2014_p13 }
 0x493   : > { %p2017_p2 = pnand %p2016_p1, %p2010_p10 }
 0x495   : > { %2020 = shalt.err (!%p2017_p2)
}
 0x496   : > { %s2102_s26 = smov 32   ;;  %s2021_s9 = scalar_lea.vmem %s3185_s8, 256 }
 0x497   : > { %1894 = dma.vmem_to_hbm [thread:$0]  (%p2163_p7), %s3177_s28, 64, %s3175_s11, %s1640_s25, %s2102_s26, %s2102_s26, %s2094_s10  }
 0x498   : > { %p2022_p3 = scmp.ne.s32.totalorder %s3185_s8, %s2021_s9  ;;  %s2103_s5 = smov [#allocation8]  }
 0x499   : > { %s2025_s4 = sshll.u32 %s2103_s5, 4  ;;  %s2026_s4 = int_to_ptr.vmem [resolvable:$false] %s2025_s4 }
 0x49a   : > { %p2023_p4 = pnand %p2022_p3, %p2163_p7  ;;  %s2027_s6 = scalar_lea.vmem %s2026_s4, 512 }
 0x49b   : > { %p2028_p8 = scmp.lt.s32.totalorder %s3185_s8, %s2026_s4  ;;  %p2029_p9 = scmp.lt.s32.totalorder %s2027_s6, %s2021_s9 }
 0x49c   : > { %p2024_p5 = pneg %p2023_p4 }
 0x49d   : > { %p2030_p10 = por %p2029_p9, %p2028_p8 }
 0x49f   : > { %p2031_p11 = pnand %p2030_p10, %p2024_p5 }
 0x4a1   : > { %2034 = shalt.err (!%p2031_p11)
}
 0x4a2   : > { %s2035_s23 = scalar_lea.hbm %s3183_s24, 256  ;;  %s2039_s11 = scalar_lea.hbm %s3261_s3, 512 }
 0x4a3   : > { %p2036_p12 = scmp.ne.s32.totalorder %s3183_s24, %s2035_s23  ;;  %p2040_p1 = scmp.lt.u32.totalorder %s3183_s24, %s3261_s3 }
 0x4a4   : > { %p2041_p2 = scmp.lt.u32.totalorder %s2039_s11, %s2035_s23  ;;  %p2043_p4 = scmp.lt.u32.totalorder %s2035_s23, %s3183_s24 }
 0x4a5   : > { %p2037_p13 = pnand %p2036_p12, %p2163_p7 }
 0x4a6   : > { %p2042_p3 = por %p2041_p2, %p2040_p1 }
 0x4a7   : > { %p2038_p0 = pneg %p2037_p13 }
 0x4a8   : > { %p2044_p5 = por %p2043_p4, %p2042_p3 }
 0x4aa   : > { %p2045_p8 = pnand %p2044_p5, %p2038_p0 }
 0x4ac   : > { %2048 = shalt.err (!%p2045_p8)
}
 0x4ad   : > { %1896 = dma.vmem_to_hbm [thread:$0]  (%p2163_p7), %s3185_s8, 256, %s3183_s24, %s3131_s29, %s2099_s30, %s2099_s30, %s2100_s7  }
 0x4ae PF: > { %p1910_p9 = scmp.ge.s32.totalorder %s2089_s15, 1  ;;  %s1716_s19 = sand.u32 1, %s2077_s12  }
 0x4af   : > { %s1717_s14 = scalar_lea.sflag [#allocation5], %s1716_s19 }
 0x4b0   : > { %p1901_p10 = pnand %p1910_p9, %p2156_p6 }
 0x4b2   : > { %2068 = dma.done.wait (!%p1901_p10), %s1717_s14, 64  }
 0x4b3   : > { %2070 = vsyncadd (!%p1901_p10), %s1717_s14, 4294967232  ;;  %s1725_s22 = sand.u32 1, %s1862_s17  }
 0x4b4   : > { %s1726_s27 = scalar_lea.sflag [#allocation7], %s1725_s22 }
 0x4b5   : > { %2072 = dma.done.wait (!%p1901_p10), %s1726_s27, 768  }
 0x4b6   : > { %2074 = vsyncadd (!%p1901_p10), %s1726_s27, 4294966528  ;;  %s20_s15 = sadd.s32 1, %s2089_s15   ;;  %s3318_s12 = smov %s2081_s13 }
 0x4b7   : > { %p17_p7 = scmp.ge.s32.totalorder %s20_s15, 3   ;;  %s3319_s13 = smov %s2161_s21 }
 0x4b8   : > { %s3320_s14 = smov %s3322_s16 }
 0x4b9   :  { %19 = sbr.rel (!%p17_p7) target bundleno = 5 (0x5), region = 178 }
 0x4c0   :  { %1740 = vsyncpa [#allocation5], 1 }
 0x4c1   :  { %1742 = vsyncpa [#allocation5 + $0x1], 1 }
 0x4c2   :  { %1743 = vsyncpa [#allocation7], 1 }
 0x4c3   :  { %1745 = vsyncpa [#allocation7 + $0x1], 1 }
 0x4c4   :  { %1746 = vsyncmov [#allocation3] }
 0x4c7   :  { %s1747_s17 = vpop.sfrf %1746 }
 0x4c8   :  { %p1886_p6 = scmp.ne.s32.totalorder %s1747_s17, 0 }
 0x4ca   :  { %1751 = shalt.err (%p1886_p6)  }
 0x4cb   :  { %1753 = vsyncmov [#allocation3 + $0x1] }
 0x4ce   :  { %s1754_s20 = vpop.sfrf %1753 }
 0x4cf   :  { %p1887_p11 = scmp.ne.s32.totalorder %s1754_s20, 0 }
 0x4d1   :  { %1758 = shalt.err (%p1887_p11)  }

</bundles_post_ra>
